<compile_context>
chip_gen: v7x
topology: tpu7x:2x2x1
jax: 0.10.0
libtpu: 0.0.40
codegen_flags: <defaults>
</compile_context>

<pallas_src>
import functools

import jax
import jax.numpy as jnp
from jax import lax
from jax.experimental import pallas as pl
from jax.experimental.pallas import tpu as pltpu


def _tokenizer_fused_kernel(lhs_ref, w_ref, o_ref, conv_scr, hp_scr, pooled_scr, *,
                            Bt, Hc, Wc, Ho, Wo, Cout, KKC, pack):
    # lhs_ref   : (Bt, Hc*Wc, KKC)  bf16 im2col patches ((di,dj,cin)-major features)
    # w_ref     : (KKC, Cout)       bf16 conv weights
    # o_ref     : (Bt, Ho, Wo//pack, pack*Cout) pooled output tile
    # conv_scr  : (Bt*Hc*Wc, Cout)  f32 conv result scratch
    # hp_scr    : (Ho, Wc, Cout)    f32 H-pooled rows scratch (reused per image)
    # pooled_scr: (Ho, Wo, Cout)    f32 fully pooled rows scratch (reused per image)
    HW = Hc * Wc

    # ---- conv: single fused im2col matmul on the MXU (bf16 x bf16 -> f32 acc) ----
    lhs = lhs_ref[...].reshape(Bt * HW, KKC)                    # leading-dim merge only
    conv_scr[...] = jnp.dot(lhs, w_ref[...],
                            preferred_element_type=jnp.float32)  # activation=None -> Identity

    # ---- fused MaxPool2d(3, 2, 1) epilogue, statically unrolled over the Bt images ----
    for b in range(Bt):
        conv = conv_scr[b * HW:(b + 1) * HW, :].reshape(Ho, 2, Wc, Cout)
        a = conv[:, 0]                                           # conv rows 2i
        bb = conv[:, 1]                                          # conv rows 2i+1
        c = jnp.concatenate([a[0:1], bb[:Ho - 1]], axis=0)      # rows 2i-1; dup row0 == -inf pad
        hp_scr[...] = jnp.maximum(jnp.maximum(a, bb), c)        # H-pooled rows [Ho, Wc, Cout]

        # W-pool: strided sublane reads from VMEM + sublane roll; fix column 0 after.
        center = hp_scr[:, pl.ds(0, Wo, stride=2), :]            # hp cols 2j
        plus = hp_scr[:, pl.ds(1, Wo, stride=2), :]              # hp cols 2j+1
        minus = pltpu.roll(plus, shift=1, axis=1)                # hp cols 2j-1 (valid for j>=1)
        pooled_scr[...] = jnp.maximum(jnp.maximum(center, plus), minus)
        # pool-padding column (j == 0): only hp cols 0 and 1 participate.
        pooled_scr[:, 0:1, :] = jnp.maximum(hp_scr[:, 0:1, :], hp_scr[:, 1:2, :])

        if pack == 2:
            # Pack (wo=2t, wo=2t+1) side by side -> 2*Cout lanes, lane-dense writeback.
            Wo2 = Wo // 2
            even = pooled_scr[:, pl.ds(0, Wo2, stride=2), :]
            odd = pooled_scr[:, pl.ds(1, Wo2, stride=2), :]
            o_ref[b] = jnp.concatenate([even, odd], axis=-1).astype(o_ref.dtype)
        else:
            o_ref[b] = pooled_scr[...].astype(o_ref.dtype)


def _pick_block_batch(B, target=8):
    """Largest divisor of B that is <= target while leaving >= 2 grid steps (when B > 1)."""
    best = 1
    for bt in range(1, B + 1):
        if B % bt:
            continue
        if bt > target:
            break
        if (B // bt) >= 2 or B == 1:
            best = bt
    return best


def tokenizer_forward(x_nchw, weight, *, kernel_size=3, stride=1, padding=1,
                      pooling_kernel_size=3, pooling_stride=2, pooling_padding=1,
                      block_batch=None):
    """Tokenizer forward (n_conv_layers=1). x_nchw: [B, Cin, H, W]; weight: [Cout, Cin, K, K]."""
    if stride != 1:
        raise NotImplementedError("fused kernel assumes conv stride == 1 (standard CCT tokenizer)")
    if (pooling_kernel_size, pooling_stride, pooling_padding) != (3, 2, 1):
        raise NotImplementedError("fused kernel assumes MaxPool2d(kernel=3, stride=2, padding=1)")

    B, Cin, H, W = x_nchw.shape
    Cout = weight.shape[0]
    K = kernel_size
    Hc = H + 2 * padding - K + 1
    Wc = W + 2 * padding - K + 1
    if (Hc % 2) or (Wc % 2):
        raise NotImplementedError("fused kernel assumes even conv output height/width")
    Ho, Wo = Hc // 2, Wc // 2
    KKC = K * K * Cin

    Bt = _pick_block_batch(B) if block_batch is None else block_batch
    if B % Bt:
        raise ValueError("block_batch must divide the batch size")

    # Lane-dense output packing: two pooled W positions per 128-lane row when Cout==64.
    pack = 2 if (Wo % 2 == 0 and Cout % 128 != 0 and (2 * Cout) % 128 == 0) else 1

    # ---- wrapper-side im2col glue (cheap XLA ops on the small stem input) ----
    # NCHW -> NHWC, conv zero-pad, gather the 9 shifted views into a 27-wide feature dim.
    x = jnp.transpose(x_nchw, (0, 2, 3, 1))
    xp = jnp.pad(x, ((0, 0), (padding, padding), (padding, padding), (0, 0)))
    patches = jnp.concatenate(
        [xp[:, di:di + Hc, dj:dj + Wc, :] for di in range(K) for dj in range(K)], axis=-1)
    lhs = patches.reshape(B, Hc * Wc, KKC).astype(jnp.bfloat16)
    # Weights -> (K*K*Cin, Cout), (di, dj, cin)-major to match the patch feature order.
    w_r = jnp.transpose(weight, (2, 3, 1, 0)).reshape(KKC, Cout).astype(jnp.bfloat16)

    kernel = functools.partial(_tokenizer_fused_kernel, Bt=Bt, Hc=Hc, Wc=Wc,
                               Ho=Ho, Wo=Wo, Cout=Cout, KKC=KKC, pack=pack)

    # TODO(synk): for large images (e.g. 224^2) on v7x (64 MiB VMEM) add a grid axis over
    # conv-row tiles with a (K-1)-row halo so whole pooled rows are produced per tile.
    pooled = pl.pallas_call(
        kernel,
        out_shape=jax.ShapeDtypeStruct((B, Ho, Wo // pack, pack * Cout), x_nchw.dtype),
        grid_spec=pltpu.PrefetchScalarGridSpec(
            num_scalar_prefetch=0,
            grid=(B // Bt,),
            in_specs=[
                pl.BlockSpec((Bt, Hc * Wc, KKC), lambda i: (i, 0, 0)),
                pl.BlockSpec((KKC, Cout), lambda i: (0, 0)),
            ],
            out_specs=pl.BlockSpec((Bt, Ho, Wo // pack, pack * Cout),
                                   lambda i: (i, 0, 0, 0)),
            scratch_shapes=[
                pltpu.VMEM((Bt * Hc * Wc, Cout), jnp.float32),   # conv result
                pltpu.VMEM((Ho, Wc, Cout), jnp.float32),         # H-pooled rows
                pltpu.VMEM((Ho, Wo, Cout), jnp.float32),         # pooled rows
            ],
        ),
        compiler_params=pltpu.CompilerParams(
            dimension_semantics=("parallel",),
            vmem_limit_bytes=64 * 1024 * 1024,
        ),
    )(lhs, w_r)

    # Flatten(2,3) + transpose(-2,-1): contiguous reshape of the (b, ho, wo, cout) layout.
    return pooled.reshape(B, Ho * Wo, Cout)


# ----------------------------------------------------------------------------------
# Pure-JAX reference (for correctness check).
# ----------------------------------------------------------------------------------
def tokenizer_reference(x_nchw, weight, *, stride=1, padding=1,
                        pooling_kernel_size=3, pooling_stride=2, pooling_padding=1):
    conv = lax.conv_general_dilated(
        x_nchw, weight, window_strides=(stride, stride),
        padding=((padding, padding), (padding, padding)),
        dimension_numbers=("NCHW", "OIHW", "NCHW"),
        precision=lax.Precision.HIGHEST,
    )
    pooled = lax.reduce_window(
        conv, -jnp.inf, lax.max,
        window_dimensions=(1, 1, pooling_kernel_size, pooling_kernel_size),
        window_strides=(1, 1, pooling_stride, pooling_stride),
        padding=((0, 0), (0, 0),
                 (pooling_padding, pooling_padding),
                 (pooling_padding, pooling_padding)),
    )
    B, C, Ho, Wo = pooled.shape
    return jnp.transpose(pooled.reshape(B, C, Ho * Wo), (0, 2, 1))


if __name__ == "__main__":
    # Module-default config: Conv2d(3 -> 64, k=3, s=1, p=1, bias=False) + MaxPool(3, 2, 1)
    B, Cin, H, W = 8, 3, 16, 16
    Cout, K = 64, 3

    key = jax.random.PRNGKey(0)
    kx, kw = jax.random.split(key)

    x = jax.random.normal(kx, (B, Cin, H, W), dtype=jnp.float32)
    # kaiming_normal_ (fan_in mode, leaky_relu a=0): std = sqrt(2 / fan_in)
    fan_in = Cin * K * K
    w = jax.random.normal(kw, (Cout, Cin, K, K), dtype=jnp.float32) * jnp.sqrt(2.0 / fan_in)

    # Pre-round to the bf16 grid so the kernel's bf16 operand cast is exact and the f32
    # reference is a tight check of the kernel logic (not of the quantization).
    x = x.astype(jnp.bfloat16).astype(jnp.float32)
    w = w.astype(jnp.bfloat16).astype(jnp.float32)

    out = tokenizer_forward(x, w, kernel_size=K, stride=1, padding=1)
    out = jax.block_until_ready(out)

    ref = tokenizer_reference(x, w)
    assert out.shape == ref.shape == (B, (H // 2) * (W // 2), Cout), out.shape
    max_err = float(jnp.max(jnp.abs(out - ref)))
    assert jnp.allclose(out, ref, rtol=1e-3, atol=1e-3), max_err

    print("KERNEL_OK")
</pallas_src>

<mosaic_0001>
module attributes {stable_mosaic.version = 11 : i64} {
  func.func @_tokenizer_fused_kernel(%arg0: i32, %arg1: memref<4x256x27xbf16, #tpu.memory_space<vmem>>, %arg2: memref<27x64xbf16, #tpu.memory_space<vmem>>, %arg3: memref<4x8x4x128xf32, #tpu.memory_space<vmem>>, %arg4: memref<1024x64xf32, #tpu.memory_space<vmem>>, %arg5: memref<8x16x64xf32, #tpu.memory_space<vmem>>, %arg6: memref<8x8x64xf32, #tpu.memory_space<vmem>>) attributes {dimension_semantics = [#tpu.dimension_semantics<parallel>], iteration_bounds = array<i64: 2>, scalar_prefetch = 0 : i64, scratch_operands = 3 : i64, tpu.core_type = #tpu.core_type<tc>, window_params = [{transform_indices = @transform_0, window_bounds = array<i64: 4, 256, 27>}, {pipeline_mode = #tpu.pipeline_mode<synchronous>, transform_indices = @transform_1, window_bounds = array<i64: 27, 64>}, {transform_indices = @transform_2, window_bounds = array<i64: 4, 8, 4, 128>}]} {
    %c0 = arith.constant 0 : index
    %c0_0 = arith.constant 0 : index
    %c0_1 = arith.constant 0 : index
    %0 = vector.load %arg1[%c0, %c0_0, %c0_1] : memref<4x256x27xbf16, #tpu.memory_space<vmem>>, vector<4x256x27xbf16>
    %1 = vector.shape_cast %0 : vector<4x256x27xbf16> to vector<1024x27xbf16>
    %c0_2 = arith.constant 0 : index
    %c0_3 = arith.constant 0 : index
    %2 = vector.load %arg2[%c0_2, %c0_3] : memref<27x64xbf16, #tpu.memory_space<vmem>>, vector<27x64xbf16>
    %cst = arith.constant dense<0.000000e+00> : vector<1024x64xf32>
    %3 = tpu.matmul %1, %2, %cst {dimension_numbers = #tpu.dot_dimension_numbers<[1], [0], [0], [1], [0, 0, 1, 1], [], []>} : vector<1024x27xbf16>, vector<27x64xbf16>, vector<1024x64xf32> -> vector<1024x64xf32>
    %c0_4 = arith.constant 0 : index
    %c0_5 = arith.constant 0 : index
    %4 = vector.load %arg4[%c0_4, %c0_5] : memref<1024x64xf32, #tpu.memory_space<vmem>>, vector<1024x64xf32>
    tpu.vector_store %arg4[%c0_4, %c0_5], %3 {strides = array<i32>} : memref<1024x64xf32, #tpu.memory_space<vmem>>, vector<1024x64xf32>,
    %c0_6 = arith.constant 0 : index
    %c0_7 = arith.constant 0 : index
    %5 = vector.load %arg4[%c0_6, %c0_7] : memref<1024x64xf32, #tpu.memory_space<vmem>>, vector<256x64xf32>
    %6 = vector.shape_cast %5 : vector<256x64xf32> to vector<8x2x16x64xf32>
    %7 = vector.extract_strided_slice %6 {offsets = [0, 0, 0, 0], sizes = [8, 1, 16, 64], strides = [1, 1, 1, 1]} : vector<8x2x16x64xf32> to vector<8x1x16x64xf32>
    %8 = vector.shape_cast %7 : vector<8x1x16x64xf32> to vector<8x16x64xf32>
    %9 = vector.extract_strided_slice %6 {offsets = [0, 1, 0, 0], sizes = [8, 1, 16, 64], strides = [1, 1, 1, 1]} : vector<8x2x16x64xf32> to vector<8x1x16x64xf32>
    %10 = vector.shape_cast %9 : vector<8x1x16x64xf32> to vector<8x16x64xf32>
    %11 = vector.extract_strided_slice %8 {offsets = [0, 0, 0], sizes = [1, 16, 64], strides = [1, 1, 1]} : vector<8x16x64xf32> to vector<1x16x64xf32>
    %12 = vector.extract_strided_slice %10 {offsets = [0, 0, 0], sizes = [7, 16, 64], strides = [1, 1, 1]} : vector<8x16x64xf32> to vector<7x16x64xf32>
    %13 = tpu.concatenate %11, %12 in 0 : vector<1x16x64xf32>, vector<7x16x64xf32> -> vector<8x16x64xf32>
    %14 = arith.maximumf %8, %10 : vector<8x16x64xf32>
    %15 = arith.maximumf %14, %13 : vector<8x16x64xf32>
    %c0_8 = arith.constant 0 : index
    %c0_9 = arith.constant 0 : index
    %c0_10 = arith.constant 0 : index
    %16 = vector.load %arg5[%c0_8, %c0_9, %c0_10] : memref<8x16x64xf32, #tpu.memory_space<vmem>>, vector<8x16x64xf32>
    tpu.vector_store %arg5[%c0_8, %c0_9, %c0_10], %15 {strides = array<i32>} : memref<8x16x64xf32, #tpu.memory_space<vmem>>, vector<8x16x64xf32>,
    %c0_11 = arith.constant 0 : index
    %c0_12 = arith.constant 0 : index
    %c0_13 = arith.constant 0 : index
    %17 = tpu.strided_load %arg5[%c0_11, %c0_12, %c0_13] {strides = array<i32: 1, 2, 1>} : memref<8x16x64xf32, #tpu.memory_space<vmem>>, vector<8x8x64xf32>
    %c0_14 = arith.constant 0 : index
    %c1 = arith.constant 1 : index
    %c0_15 = arith.constant 0 : index
    %18 = tpu.strided_load %arg5[%c0_14, %c1, %c0_15] {strides = array<i32: 1, 2, 1>} : memref<8x16x64xf32, #tpu.memory_space<vmem>>, vector<8x8x64xf32>
    %c1_i32 = arith.constant 1 : i32
    %19 = tpu.dynamic_rotate %18 by %c1_i32 dim 1 : vector<8x8x64xf32>, i32 -> vector<8x8x64xf32>
    %20 = arith.maximumf %17, %18 : vector<8x8x64xf32>
    %21 = arith.maximumf %20, %19 : vector<8x8x64xf32>
    %c0_16 = arith.constant 0 : index
    %c0_17 = arith.constant 0 : index
    %c0_18 = arith.constant 0 : index
    %22 = vector.load %arg6[%c0_16, %c0_17, %c0_18] : memref<8x8x64xf32, #tpu.memory_space<vmem>>, vector<8x8x64xf32>
    tpu.vector_store %arg6[%c0_16, %c0_17, %c0_18], %21 {strides = array<i32>} : memref<8x8x64xf32, #tpu.memory_space<vmem>>, vector<8x8x64xf32>,
    %c0_19 = arith.constant 0 : index
    %c0_20 = arith.constant 0 : index
    %c0_21 = arith.constant 0 : index
    %23 = vector.load %arg5[%c0_19, %c0_20, %c0_21] : memref<8x16x64xf32, #tpu.memory_space<vmem>>, vector<8x1x64xf32>
    %c0_22 = arith.constant 0 : index
    %c1_23 = arith.constant 1 : index
    %c0_24 = arith.constant 0 : index
    %24 = vector.load %arg5[%c0_22, %c1_23, %c0_24] : memref<8x16x64xf32, #tpu.memory_space<vmem>>, vector<8x1x64xf32>
    %25 = arith.maximumf %23, %24 : vector<8x1x64xf32>
    %c0_25 = arith.constant 0 : index
    %c0_26 = arith.constant 0 : index
    %c0_27 = arith.constant 0 : index
    %26 = vector.load %arg6[%c0_25, %c0_26, %c0_27] : memref<8x8x64xf32, #tpu.memory_space<vmem>>, vector<8x1x64xf32>
    tpu.vector_store %arg6[%c0_25, %c0_26, %c0_27], %25 {strides = array<i32>} : memref<8x8x64xf32, #tpu.memory_space<vmem>>, vector<8x1x64xf32>,
    %c0_28 = arith.constant 0 : index
    %c0_29 = arith.constant 0 : index
    %c0_30 = arith.constant 0 : index
    %27 = tpu.strided_load %arg6[%c0_28, %c0_29, %c0_30] {strides = array<i32: 1, 2, 1>} : memref<8x8x64xf32, #tpu.memory_space<vmem>>, vector<8x4x64xf32>
    %c0_31 = arith.constant 0 : index
    %c1_32 = arith.constant 1 : index
    %c0_33 = arith.constant 0 : index
    %28 = tpu.strided_load %arg6[%c0_31, %c1_32, %c0_33] {strides = array<i32: 1, 2, 1>} : memref<8x8x64xf32, #tpu.memory_space<vmem>>, vector<8x4x64xf32>
    %29 = tpu.concatenate %27, %28 in 2 : vector<8x4x64xf32>, vector<8x4x64xf32> -> vector<8x4x128xf32>
    %c0_34 = arith.constant 0 : index
    %c0_35 = arith.constant 0 : index
    %c0_36 = arith.constant 0 : index
    %c0_37 = arith.constant 0 : index
    %30 = vector.load %arg3[%c0_34, %c0_35, %c0_36, %c0_37] : memref<4x8x4x128xf32, #tpu.memory_space<vmem>>, vector<1x8x4x128xf32>
    %31 = vector.shape_cast %30 : vector<1x8x4x128xf32> to vector<8x4x128xf32>
    %32 = vector.shape_cast %29 : vector<8x4x128xf32> to vector<1x8x4x128xf32>
    tpu.vector_store %arg3[%c0_34, %c0_35, %c0_36, %c0_37], %32 {strides = array<i32>} : memref<4x8x4x128xf32, #tpu.memory_space<vmem>>, vector<1x8x4x128xf32>,
    %c256 = arith.constant 256 : index
    %c0_38 = arith.constant 0 : index
    %33 = vector.load %arg4[%c256, %c0_38] : memref<1024x64xf32, #tpu.memory_space<vmem>>, vector<256x64xf32>
    %34 = vector.shape_cast %33 : vector<256x64xf32> to vector<8x2x16x64xf32>
    %35 = vector.extract_strided_slice %34 {offsets = [0, 0, 0, 0], sizes = [8, 1, 16, 64], strides = [1, 1, 1, 1]} : vector<8x2x16x64xf32> to vector<8x1x16x64xf32>
    %36 = vector.shape_cast %35 : vector<8x1x16x64xf32> to vector<8x16x64xf32>
    %37 = vector.extract_strided_slice %34 {offsets = [0, 1, 0, 0], sizes = [8, 1, 16, 64], strides = [1, 1, 1, 1]} : vector<8x2x16x64xf32> to vector<8x1x16x64xf32>
    %38 = vector.shape_cast %37 : vector<8x1x16x64xf32> to vector<8x16x64xf32>
    %39 = vector.extract_strided_slice %36 {offsets = [0, 0, 0], sizes = [1, 16, 64], strides = [1, 1, 1]} : vector<8x16x64xf32> to vector<1x16x64xf32>
    %40 = vector.extract_strided_slice %38 {offsets = [0, 0, 0], sizes = [7, 16, 64], strides = [1, 1, 1]} : vector<8x16x64xf32> to vector<7x16x64xf32>
    %41 = tpu.concatenate %39, %40 in 0 : vector<1x16x64xf32>, vector<7x16x64xf32> -> vector<8x16x64xf32>
    %42 = arith.maximumf %36, %38 : vector<8x16x64xf32>
    %43 = arith.maximumf %42, %41 : vector<8x16x64xf32>
    %c0_39 = arith.constant 0 : index
    %c0_40 = arith.constant 0 : index
    %c0_41 = arith.constant 0 : index
    %44 = vector.load %arg5[%c0_39, %c0_40, %c0_41] : memref<8x16x64xf32, #tpu.memory_space<vmem>>, vector<8x16x64xf32>
    tpu.vector_store %arg5[%c0_39, %c0_40, %c0_41], %43 {strides = array<i32>} : memref<8x16x64xf32, #tpu.memory_space<vmem>>, vector<8x16x64xf32>,
    %c0_42 = arith.constant 0 : index
    %c0_43 = arith.constant 0 : index
    %c0_44 = arith.constant 0 : index
    %45 = tpu.strided_load %arg5[%c0_42, %c0_43, %c0_44] {strides = array<i32: 1, 2, 1>} : memref<8x16x64xf32, #tpu.memory_space<vmem>>, vector<8x8x64xf32>
    %c0_45 = arith.constant 0 : index
    %c1_46 = arith.constant 1 : index
    %c0_47 = arith.constant 0 : index
    %46 = tpu.strided_load %arg5[%c0_45, %c1_46, %c0_47] {strides = array<i32: 1, 2, 1>} : memref<8x16x64xf32, #tpu.memory_space<vmem>>, vector<8x8x64xf32>
    %c1_i32_48 = arith.constant 1 : i32
    %47 = tpu.dynamic_rotate %46 by %c1_i32_48 dim 1 : vector<8x8x64xf32>, i32 -> vector<8x8x64xf32>
    %48 = arith.maximumf %45, %46 : vector<8x8x64xf32>
    %49 = arith.maximumf %48, %47 : vector<8x8x64xf32>
    %c0_49 = arith.constant 0 : index
    %c0_50 = arith.constant 0 : index
    %c0_51 = arith.constant 0 : index
    %50 = vector.load %arg6[%c0_49, %c0_50, %c0_51] : memref<8x8x64xf32, #tpu.memory_space<vmem>>, vector<8x8x64xf32>
    tpu.vector_store %arg6[%c0_49, %c0_50, %c0_51], %49 {strides = array<i32>} : memref<8x8x64xf32, #tpu.memory_space<vmem>>, vector<8x8x64xf32>,
    %c0_52 = arith.constant 0 : index
    %c0_53 = arith.constant 0 : index
    %c0_54 = arith.constant 0 : index
    %51 = vector.load %arg5[%c0_52, %c0_53, %c0_54] : memref<8x16x64xf32, #tpu.memory_space<vmem>>, vector<8x1x64xf32>
    %c0_55 = arith.constant 0 : index
    %c1_56 = arith.constant 1 : index
    %c0_57 = arith.constant 0 : index
    %52 = vector.load %arg5[%c0_55, %c1_56, %c0_57] : memref<8x16x64xf32, #tpu.memory_space<vmem>>, vector<8x1x64xf32>
    %53 = arith.maximumf %51, %52 : vector<8x1x64xf32>
    %c0_58 = arith.constant 0 : index
    %c0_59 = arith.constant 0 : index
    %c0_60 = arith.constant 0 : index
    %54 = vector.load %arg6[%c0_58, %c0_59, %c0_60] : memref<8x8x64xf32, #tpu.memory_space<vmem>>, vector<8x1x64xf32>
    tpu.vector_store %arg6[%c0_58, %c0_59, %c0_60], %53 {strides = array<i32>} : memref<8x8x64xf32, #tpu.memory_space<vmem>>, vector<8x1x64xf32>,
    %c0_61 = arith.constant 0 : index
    %c0_62 = arith.constant 0 : index
    %c0_63 = arith.constant 0 : index
    %55 = tpu.strided_load %arg6[%c0_61, %c0_62, %c0_63] {strides = array<i32: 1, 2, 1>} : memref<8x8x64xf32, #tpu.memory_space<vmem>>, vector<8x4x64xf32>
    %c0_64 = arith.constant 0 : index
    %c1_65 = arith.constant 1 : index
    %c0_66 = arith.constant 0 : index
    %56 = tpu.strided_load %arg6[%c0_64, %c1_65, %c0_66] {strides = array<i32: 1, 2, 1>} : memref<8x8x64xf32, #tpu.memory_space<vmem>>, vector<8x4x64xf32>
    %57 = tpu.concatenate %55, %56 in 2 : vector<8x4x64xf32>, vector<8x4x64xf32> -> vector<8x4x128xf32>
    %c1_67 = arith.constant 1 : index
    %c0_68 = arith.constant 0 : index
    %c0_69 = arith.constant 0 : index
    %c0_70 = arith.constant 0 : index
    %58 = vector.load %arg3[%c1_67, %c0_68, %c0_69, %c0_70] : memref<4x8x4x128xf32, #tpu.memory_space<vmem>>, vector<1x8x4x128xf32>
    %59 = vector.shape_cast %58 : vector<1x8x4x128xf32> to vector<8x4x128xf32>
    %60 = vector.shape_cast %57 : vector<8x4x128xf32> to vector<1x8x4x128xf32>
    tpu.vector_store %arg3[%c1_67, %c0_68, %c0_69, %c0_70], %60 {strides = array<i32>} : memref<4x8x4x128xf32, #tpu.memory_space<vmem>>, vector<1x8x4x128xf32>,
    %c512 = arith.constant 512 : index
    %c0_71 = arith.constant 0 : index
    %61 = vector.load %arg4[%c512, %c0_71] : memref<1024x64xf32, #tpu.memory_space<vmem>>, vector<256x64xf32>
    %62 = vector.shape_cast %61 : vector<256x64xf32> to vector<8x2x16x64xf32>
    %63 = vector.extract_strided_slice %62 {offsets = [0, 0, 0, 0], sizes = [8, 1, 16, 64], strides = [1, 1, 1, 1]} : vector<8x2x16x64xf32> to vector<8x1x16x64xf32>
    %64 = vector.shape_cast %63 : vector<8x1x16x64xf32> to vector<8x16x64xf32>
    %65 = vector.extract_strided_slice %62 {offsets = [0, 1, 0, 0], sizes = [8, 1, 16, 64], strides = [1, 1, 1, 1]} : vector<8x2x16x64xf32> to vector<8x1x16x64xf32>
    %66 = vector.shape_cast %65 : vector<8x1x16x64xf32> to vector<8x16x64xf32>
    %67 = vector.extract_strided_slice %64 {offsets = [0, 0, 0], sizes = [1, 16, 64], strides = [1, 1, 1]} : vector<8x16x64xf32> to vector<1x16x64xf32>
    %68 = vector.extract_strided_slice %66 {offsets = [0, 0, 0], sizes = [7, 16, 64], strides = [1, 1, 1]} : vector<8x16x64xf32> to vector<7x16x64xf32>
    %69 = tpu.concatenate %67, %68 in 0 : vector<1x16x64xf32>, vector<7x16x64xf32> -> vector<8x16x64xf32>
    %70 = arith.maximumf %64, %66 : vector<8x16x64xf32>
    %71 = arith.maximumf %70, %69 : vector<8x16x64xf32>
    %c0_72 = arith.constant 0 : index
    %c0_73 = arith.constant 0 : index
    %c0_74 = arith.constant 0 : index
    %72 = vector.load %arg5[%c0_72, %c0_73, %c0_74] : memref<8x16x64xf32, #tpu.memory_space<vmem>>, vector<8x16x64xf32>
    tpu.vector_store %arg5[%c0_72, %c0_73, %c0_74], %71 {strides = array<i32>} : memref<8x16x64xf32, #tpu.memory_space<vmem>>, vector<8x16x64xf32>,
    %c0_75 = arith.constant 0 : index
    %c0_76 = arith.constant 0 : index
    %c0_77 = arith.constant 0 : index
    %73 = tpu.strided_load %arg5[%c0_75, %c0_76, %c0_77] {strides = array<i32: 1, 2, 1>} : memref<8x16x64xf32, #tpu.memory_space<vmem>>, vector<8x8x64xf32>
    %c0_78 = arith.constant 0 : index
    %c1_79 = arith.constant 1 : index
    %c0_80 = arith.constant 0 : index
    %74 = tpu.strided_load %arg5[%c0_78, %c1_79, %c0_80] {strides = array<i32: 1, 2, 1>} : memref<8x16x64xf32, #tpu.memory_space<vmem>>, vector<8x8x64xf32>
    %c1_i32_81 = arith.constant 1 : i32
    %75 = tpu.dynamic_rotate %74 by %c1_i32_81 dim 1 : vector<8x8x64xf32>, i32 -> vector<8x8x64xf32>
    %76 = arith.maximumf %73, %74 : vector<8x8x64xf32>
    %77 = arith.maximumf %76, %75 : vector<8x8x64xf32>
    %c0_82 = arith.constant 0 : index
    %c0_83 = arith.constant 0 : index
    %c0_84 = arith.constant 0 : index
    %78 = vector.load %arg6[%c0_82, %c0_83, %c0_84] : memref<8x8x64xf32, #tpu.memory_space<vmem>>, vector<8x8x64xf32>
    tpu.vector_store %arg6[%c0_82, %c0_83, %c0_84], %77 {strides = array<i32>} : memref<8x8x64xf32, #tpu.memory_space<vmem>>, vector<8x8x64xf32>,
    %c0_85 = arith.constant 0 : index
    %c0_86 = arith.constant 0 : index
    %c0_87 = arith.constant 0 : index
    %79 = vector.load %arg5[%c0_85, %c0_86, %c0_87] : memref<8x16x64xf32, #tpu.memory_space<vmem>>, vector<8x1x64xf32>
    %c0_88 = arith.constant 0 : index
    %c1_89 = arith.constant 1 : index
    %c0_90 = arith.constant 0 : index
    %80 = vector.load %arg5[%c0_88, %c1_89, %c0_90] : memref<8x16x64xf32, #tpu.memory_space<vmem>>, vector<8x1x64xf32>
    %81 = arith.maximumf %79, %80 : vector<8x1x64xf32>
    %c0_91 = arith.constant 0 : index
    %c0_92 = arith.constant 0 : index
    %c0_93 = arith.constant 0 : index
    %82 = vector.load %arg6[%c0_91, %c0_92, %c0_93] : memref<8x8x64xf32, #tpu.memory_space<vmem>>, vector<8x1x64xf32>
    tpu.vector_store %arg6[%c0_91, %c0_92, %c0_93], %81 {strides = array<i32>} : memref<8x8x64xf32, #tpu.memory_space<vmem>>, vector<8x1x64xf32>,
    %c0_94 = arith.constant 0 : index
    %c0_95 = arith.constant 0 : index
    %c0_96 = arith.constant 0 : index
    %83 = tpu.strided_load %arg6[%c0_94, %c0_95, %c0_96] {strides = array<i32: 1, 2, 1>} : memref<8x8x64xf32, #tpu.memory_space<vmem>>, vector<8x4x64xf32>
    %c0_97 = arith.constant 0 : index
    %c1_98 = arith.constant 1 : index
    %c0_99 = arith.constant 0 : index
    %84 = tpu.strided_load %arg6[%c0_97, %c1_98, %c0_99] {strides = array<i32: 1, 2, 1>} : memref<8x8x64xf32, #tpu.memory_space<vmem>>, vector<8x4x64xf32>
    %85 = tpu.concatenate %83, %84 in 2 : vector<8x4x64xf32>, vector<8x4x64xf32> -> vector<8x4x128xf32>
    %c2 = arith.constant 2 : index
    %c0_100 = arith.constant 0 : index
    %c0_101 = arith.constant 0 : index
    %c0_102 = arith.constant 0 : index
    %86 = vector.load %arg3[%c2, %c0_100, %c0_101, %c0_102] : memref<4x8x4x128xf32, #tpu.memory_space<vmem>>, vector<1x8x4x128xf32>
    %87 = vector.shape_cast %86 : vector<1x8x4x128xf32> to vector<8x4x128xf32>
    %88 = vector.shape_cast %85 : vector<8x4x128xf32> to vector<1x8x4x128xf32>
    tpu.vector_store %arg3[%c2, %c0_100, %c0_101, %c0_102], %88 {strides = array<i32>} : memref<4x8x4x128xf32, #tpu.memory_space<vmem>>, vector<1x8x4x128xf32>,
    %c768 = arith.constant 768 : index
    %c0_103 = arith.constant 0 : index
    %89 = vector.load %arg4[%c768, %c0_103] : memref<1024x64xf32, #tpu.memory_space<vmem>>, vector<256x64xf32>
    %90 = vector.shape_cast %89 : vector<256x64xf32> to vector<8x2x16x64xf32>
    %91 = vector.extract_strided_slice %90 {offsets = [0, 0, 0, 0], sizes = [8, 1, 16, 64], strides = [1, 1, 1, 1]} : vector<8x2x16x64xf32> to vector<8x1x16x64xf32>
    %92 = vector.shape_cast %91 : vector<8x1x16x64xf32> to vector<8x16x64xf32>
    %93 = vector.extract_strided_slice %90 {offsets = [0, 1, 0, 0], sizes = [8, 1, 16, 64], strides = [1, 1, 1, 1]} : vector<8x2x16x64xf32> to vector<8x1x16x64xf32>
    %94 = vector.shape_cast %93 : vector<8x1x16x64xf32> to vector<8x16x64xf32>
    %95 = vector.extract_strided_slice %92 {offsets = [0, 0, 0], sizes = [1, 16, 64], strides = [1, 1, 1]} : vector<8x16x64xf32> to vector<1x16x64xf32>
    %96 = vector.extract_strided_slice %94 {offsets = [0, 0, 0], sizes = [7, 16, 64], strides = [1, 1, 1]} : vector<8x16x64xf32> to vector<7x16x64xf32>
    %97 = tpu.concatenate %95, %96 in 0 : vector<1x16x64xf32>, vector<7x16x64xf32> -> vector<8x16x64xf32>
    %98 = arith.maximumf %92, %94 : vector<8x16x64xf32>
    %99 = arith.maximumf %98, %97 : vector<8x16x64xf32>
    %c0_104 = arith.constant 0 : index
    %c0_105 = arith.constant 0 : index
    %c0_106 = arith.constant 0 : index
    %100 = vector.load %arg5[%c0_104, %c0_105, %c0_106] : memref<8x16x64xf32, #tpu.memory_space<vmem>>, vector<8x16x64xf32>
    tpu.vector_store %arg5[%c0_104, %c0_105, %c0_106], %99 {strides = array<i32>} : memref<8x16x64xf32, #tpu.memory_space<vmem>>, vector<8x16x64xf32>,
    %c0_107 = arith.constant 0 : index
    %c0_108 = arith.constant 0 : index
    %c0_109 = arith.constant 0 : index
    %101 = tpu.strided_load %arg5[%c0_107, %c0_108, %c0_109] {strides = array<i32: 1, 2, 1>} : memref<8x16x64xf32, #tpu.memory_space<vmem>>, vector<8x8x64xf32>
    %c0_110 = arith.constant 0 : index
    %c1_111 = arith.constant 1 : index
    %c0_112 = arith.constant 0 : index
    %102 = tpu.strided_load %arg5[%c0_110, %c1_111, %c0_112] {strides = array<i32: 1, 2, 1>} : memref<8x16x64xf32, #tpu.memory_space<vmem>>, vector<8x8x64xf32>
    %c1_i32_113 = arith.constant 1 : i32
    %103 = tpu.dynamic_rotate %102 by %c1_i32_113 dim 1 : vector<8x8x64xf32>, i32 -> vector<8x8x64xf32>
    %104 = arith.maximumf %101, %102 : vector<8x8x64xf32>
    %105 = arith.maximumf %104, %103 : vector<8x8x64xf32>
    %c0_114 = arith.constant 0 : index
    %c0_115 = arith.constant 0 : index
    %c0_116 = arith.constant 0 : index
    %106 = vector.load %arg6[%c0_114, %c0_115, %c0_116] : memref<8x8x64xf32, #tpu.memory_space<vmem>>, vector<8x8x64xf32>
    tpu.vector_store %arg6[%c0_114, %c0_115, %c0_116], %105 {strides = array<i32>} : memref<8x8x64xf32, #tpu.memory_space<vmem>>, vector<8x8x64xf32>,
    %c0_117 = arith.constant 0 : index
    %c0_118 = arith.constant 0 : index
    %c0_119 = arith.constant 0 : index
    %107 = vector.load %arg5[%c0_117, %c0_118, %c0_119] : memref<8x16x64xf32, #tpu.memory_space<vmem>>, vector<8x1x64xf32>
    %c0_120 = arith.constant 0 : index
    %c1_121 = arith.constant 1 : index
    %c0_122 = arith.constant 0 : index
    %108 = vector.load %arg5[%c0_120, %c1_121, %c0_122] : memref<8x16x64xf32, #tpu.memory_space<vmem>>, vector<8x1x64xf32>
    %109 = arith.maximumf %107, %108 : vector<8x1x64xf32>
    %c0_123 = arith.constant 0 : index
    %c0_124 = arith.constant 0 : index
    %c0_125 = arith.constant 0 : index
    %110 = vector.load %arg6[%c0_123, %c0_124, %c0_125] : memref<8x8x64xf32, #tpu.memory_space<vmem>>, vector<8x1x64xf32>
    tpu.vector_store %arg6[%c0_123, %c0_124, %c0_125], %109 {strides = array<i32>} : memref<8x8x64xf32, #tpu.memory_space<vmem>>, vector<8x1x64xf32>,
    %c0_126 = arith.constant 0 : index
    %c0_127 = arith.constant 0 : index
    %c0_128 = arith.constant 0 : index
    %111 = tpu.strided_load %arg6[%c0_126, %c0_127, %c0_128] {strides = array<i32: 1, 2, 1>} : memref<8x8x64xf32, #tpu.memory_space<vmem>>, vector<8x4x64xf32>
    %c0_129 = arith.constant 0 : index
    %c1_130 = arith.constant 1 : index
    %c0_131 = arith.constant 0 : index
    %112 = tpu.strided_load %arg6[%c0_129, %c1_130, %c0_131] {strides = array<i32: 1, 2, 1>} : memref<8x8x64xf32, #tpu.memory_space<vmem>>, vector<8x4x64xf32>
    %113 = tpu.concatenate %111, %112 in 2 : vector<8x4x64xf32>, vector<8x4x64xf32> -> vector<8x4x128xf32>
    %c3 = arith.constant 3 : index
    %c0_132 = arith.constant 0 : index
    %c0_133 = arith.constant 0 : index
    %c0_134 = arith.constant 0 : index
    %114 = vector.load %arg3[%c3, %c0_132, %c0_133, %c0_134] : memref<4x8x4x128xf32, #tpu.memory_space<vmem>>, vector<1x8x4x128xf32>
    %115 = vector.shape_cast %114 : vector<1x8x4x128xf32> to vector<8x4x128xf32>
    %116 = vector.shape_cast %113 : vector<8x4x128xf32> to vector<1x8x4x128xf32>
    tpu.vector_store %arg3[%c3, %c0_132, %c0_133, %c0_134], %116 {strides = array<i32>} : memref<4x8x4x128xf32, #tpu.memory_space<vmem>>, vector<1x8x4x128xf32>,
    return
  }
  func.func @transform_0(%arg0: i32) -> (i32, i32, i32) {
    %c0_i32 = arith.constant 0 : i32
    %c0_i32_0 = arith.constant 0 : i32
    %c0_i32_1 = arith.constant 0 : i32
    return %arg0, %c0_i32, %c0_i32_0 : i32, i32, i32
  }
  func.func @transform_1(%arg0: i32) -> (i32, i32) {
    %c0_i32 = arith.constant 0 : i32
    %c0_i32_0 = arith.constant 0 : i32
    %c0_i32_1 = arith.constant 0 : i32
    return %c0_i32, %c0_i32_0 : i32, i32
  }
  func.func @transform_2(%arg0: i32) -> (i32, i32, i32, i32) {
    %c0_i32 = arith.constant 0 : i32
    %c0_i32_0 = arith.constant 0 : i32
    %c0_i32_1 = arith.constant 0 : i32
    %c0_i32_2 = arith.constant 0 : i32
    return %arg0, %c0_i32, %c0_i32_0, %c0_i32_1 : i32, i32, i32, i32
  }
}

</mosaic_0001>

<bundles_post_ra>
// kernel: tpu_custom_call.1
= control target key start
LH: loop header
LB: loop body
LE: loop exit
PB: predicated region body
PF: predicated region fallthrough
CT: control target
= control target key end

     0   :  { %7 = vsyncpa [#allocation6], 0  ;;  %s4213_s0 = inlined_call_operand.hbm [shape: bf16[8,256,27], index: 0, kind: input, shape index: {}]   ;;  %s4214_s1 = inlined_call_operand.hbm [shape: bf16[27,64], index: 1, kind: input, shape index: {}]   ;;  %s4215_s2 = inlined_call_operand.hbm [shape: f32[8,8,4,128], index: 2, kind: output, shape index: {}]  }
   0x1   :  { %9 = vsyncpa [#allocation6 + $0x1], 0 }
   0x2   :  { %10 = vsyncpa [#allocation9], 0 }
   0x3   :  { %11 = vsyncpa [#allocation7], 0 }
   0x4   :  { %13 = vsyncpa [#allocation7 + $0x1], 0  ;;  %s3205_s9 = smov 0   ;;  %s3207_s10 = smov 0  }
   0x5   :  { %s3209_s11 = smov 0   ;;  %s3211_s12 = smov 0  }
   0x6 LB: > { %s3226_s13 = sadd.s32 4294967295, %s3180_s12   ;;  %s2546_s14 = sadd.s32 4294967294, %s3180_s12   ;;  %s3180_s12 = sphi %s3211_s12, %s4235_s12   ;;  %s3176_s11 = sphi %s3209_s11, %s4234_s11   ;;  %s3172_s10 = sphi %s3207_s10, %s4233_s10   ;;  %s3168_s9 = sphi %s3205_s9, %s4232_s9  }
   0x7   : > { %p39_p0 = scmp.ne.s32.totalorder %s3172_s10, %s3168_s9  ;;  %p4216_p1 = scmp.eq.s32.totalorder %s3226_s13, 0 }
   0x8   : > { %p90_p3 = scmp.eq.s32.totalorder %s2546_s14, 1  ;;  %p2547_p5 = scmp.ge.s32.totalorder %s3180_s12, 1 }
   0x9   : > { %p3235_p4 = por %p4216_p1, %p39_p0  ;;  %p97_p7 = scmp.lt.s32.totalorder %s3180_s12, 3 }
   0xa   : > { %p3240_p6 = por %p90_p3, %p39_p0  ;;  %s3182_s18 = smov [#allocation8]  }
   0xb   : > { %s4219_s15 = scalar_select %p3235_p4, 1, 0 }
   0xc   : > { %s4220_s16 = scalar_select %p3240_p6, 1, 0 }
   0xd   : > { %p3245_p8 = pnand %p2547_p5, %p97_p7  ;;  %s109_s19 = sshll.u32 %s3182_s18, 4  ;;  %s3249_s19 = int_to_ptr.vmem [resolvable:$true] %s109_s19 }
   0xe   : > { %s3261_s21 = sadd.s32 1, %s3180_s12   ;;  %s26_s22 = sadd.s32 1, %s3176_s11 }
   0xf   : > { %s4221_s17 = scalar_select %p3245_p8, 1, 0 }
  0x10   : > { %p2932_p9 = pneg %p3245_p8  ;;  %s23_s23 = ssub.s32 %s3180_s12, %s3261_s21 }
  0x11   : > { %s3052_s26 = scalar_lea.hbm %s4214_s1, 256 }
  0x12   : > { %p3256_p11 = pnand %p2932_p9, %p4216_p1  ;;  %p3053_p12 = scmp.ne.s32.totalorder %s4214_s1, %s3052_s26 }
  0x13   : > { %p3059_p5 = scmp.lt.u32.totalorder %s3052_s26, %s4214_s1 }
  0x14   : > { %p3054_p13 = pneg %p3256_p11 }
  0x16   : > { %p3055_p0 = pnand %p3054_p13, %p3053_p12 }
  0x18   : > { %p3056_p3 = pneg %p3055_p0 }
  0x1a   : > { %p3061_p7 = pnand %p3059_p5, %p3056_p3 }
  0x1c   : > { %3064 = shalt.err (!%p3061_p7)
}
  0x1d   : > { %s3065_s3 = scalar_lea.vmem %s3249_s19, 256  ;;  %p3073_p2 = scmp.lt.s32.totalorder %s3249_s19, %s3249_s19 }
  0x1e   : > { %p3066_p9 = scmp.ne.s32.totalorder %s3249_s19, %s3065_s3  ;;  %p3074_p6 = scmp.lt.s32.totalorder %s3065_s3, %s3065_s3 }
  0x20   : > { %p3068_p10 = pnand %p3066_p9, %p3054_p13  ;;  %p3075_p4 = por %p3074_p6, %p3073_p2 }
  0x22   : > { %p3069_p1 = pneg %p3068_p10 }
  0x24   : > { %p3076_p8 = pnand %p3075_p4, %p3069_p1 }
  0x26   : > { %3079 = shalt.err (!%p3076_p8)
}
  0x27   : > { %s3183_s4 = smov 64   ;;  %s3184_s5 = smov 4  }
  0x28   : > { %2935 = dma.hbm_to_vmem [thread:$0]  (!%p3256_p11), %s4214_s1, 256, %s3249_s19, [#allocation9], %s3183_s4, %s3183_s4, %s3184_s5  }
  0x29   : > { %p24_p1 = scmp.eq.s32.totalorder %s23_s23, 0  ;;  %p33_p2 = scmp.ne.s32.totalorder %s3176_s11, %s3172_s10 }
  0x2a   : > { %p34_p4 = scmp.eq.s32.totalorder %s3180_s12, 0  ;;  %p2945_p6 = scmp.lt.s32.totalorder %s3180_s12, 2 }
  0x2b   : > { %s3295_s8 = scalar_select %p24_p1, %s3176_s11, %s26_s22  }
  0x2c   : > { %p35_p8 = por %p34_p4, %p33_p2  ;;  %p4223_p10 = scmp.eq.s32.totalorder %s3226_s13, 1 }
  0x2d   : > { %s123_s18 = sand.u32 1, %s3176_s11   ;;  %s2719_s20 = sshll.u32 %s3180_s12, 13 }
  0x2e   : > { %p3299_p12 = por %p4223_p10, %p33_p2  ;;  %s2550_s24 = sshll.u32 %s123_s18, 9 }
  0x2f   : > { %s3308_s27 = scalar_lea.hbm %s4213_s0, %s2719_s20  ;;  %s127_s19 = scalar_lea.vmem [#allocation5], %s2550_s24 }
  0x30   : > { %s135_s22 = sshll.u32 %s127_s19, 4  ;;  %p3310_p11 = pnand %p2945_p6, %p35_p8  ;;  %s3314_s22 = int_to_ptr.vmem [resolvable:$true] %s135_s22 }
  0x31   : > { %s3316_s28 = scalar_lea.sflag [#allocation6], %s123_s18  ;;  %s3080_s29 = scalar_lea.hbm %s3308_s27, 8192 }
  0x32   : > { %p3081_p13 = scmp.ne.s32.totalorder %s3308_s27, %s3080_s29  ;;  %p3082_p0 = pneg %p3310_p11 }
  0x33   : > { %s3085_s6 = scalar_lea.hbm %s4213_s0, 16384  ;;  %p3086_p7 = scmp.lt.u32.totalorder %s3308_s27, %s4213_s0 }
  0x34   : > { %p3083_p3 = pnand %p3082_p0, %p3081_p13  ;;  %p3087_p9 = scmp.lt.u32.totalorder %s3085_s6, %s3080_s29 }
  0x35   : > { %p3089_p2 = scmp.lt.u32.totalorder %s3080_s29, %s3308_s27 }
  0x36   : > { %p3084_p5 = pneg %p3083_p3  ;;  %p3088_p1 = por %p3087_p9, %p3086_p7 }
  0x38   : > { %p3090_p4 = por %p3089_p2, %p3088_p1 }
  0x3a   : > { %p3091_p6 = pnand %p3090_p4, %p3084_p5 }
  0x3c   : > { %3094 = shalt.err (!%p3091_p6)
}
  0x3d   : > { %s3095_s18 = scalar_lea.vmem %s3314_s22, 8192  ;;  %s3185_s24 = smov [#allocation5]  }
  0x3e   : > { %p3096_p8 = scmp.ne.s32.totalorder %s3314_s22, %s3095_s18  ;;  %s3100_s25 = sshll.u32 %s3185_s24, 4  ;;  %s3101_s25 = int_to_ptr.vmem [resolvable:$false] %s3100_s25 }
  0x3f   : > { %s3102_s26 = scalar_lea.vmem %s3101_s25, 16384  ;;  %p3103_p3 = scmp.lt.s32.totalorder %s3314_s22, %s3101_s25 }
  0x40   : > { %p3098_p10 = pnand %p3096_p8, %p3082_p0  ;;  %p3104_p7 = scmp.lt.s32.totalorder %s3102_s26, %s3095_s18 }
  0x42   : > { %p3099_p13 = pneg %p3098_p10  ;;  %p3105_p9 = por %p3104_p7, %p3103_p3 }
  0x44   : > { %p3106_p1 = pnand %p3105_p9, %p3099_p13 }
  0x46   : > { %3109 = shalt.err (!%p3106_p1)
}
  0x47   : > { %2939 = dma.hbm_to_vmem [thread:$0]  (!%p3310_p11), %s3308_s27, 8192, %s3314_s22, %s3316_s28, %s3183_s4, %s3183_s4, %s3184_s5  }
  0x48   : > { %p4226_p0 = scmp.ne.s32.totalorder %s4221_s17, 0 }
  0x49   : > { %s3350_s19 = sand.u32 (!%p4226_p0), 1, %s3172_s10   ;;  %p4227_p5 = scmp.ne.s32.totalorder (!%p4226_p0), %s4219_s15, 0 }
  0x4a   : > { %147 = sbr.rel (%p4226_p0) target bundleno = 642 (0x282), region = 28  ;;  %s2555_s29 = sshll.u32 (!%p4226_p0), %s3350_s19, 9 }
  0x4b   : > { %s150_s30 = scalar_lea.sflag (!%p4226_p0), [#allocation6], %s3350_s19  ;;  %s3354_s3 = scalar_lea.vmem (!%p4226_p0), [#allocation5], %s2555_s29 }
  0x51   : > { %3155 = dma.done.wait (%p4227_p5), %s150_s30, 8192  }
  0x52   : > { %3157 = vsyncadd (%p4227_p5), %s150_s30, 4294959104  ;;  %p4228_p11 = scmp.eq.s32.totalorder %s3226_s13, 0 }
  0x54   : > { %3159 = dma.done.wait (%p4228_p11), [#allocation9], 256   ;;  %p4229_p2 = pmov %p4228_p11 }
  0x55   : > { %vm837_vm0 = vcmask 1044480   ;;  %vm838_vm1 = vcmask 1045504   ;;  %v3186_v0 = vmov 65535   ;;  %vm644_vm2 = vcmask 220160   ;;  %v2986_v2 = vld [vmem:[#allocation8] sm:$0xff]   ;;  %v2989_v8 = vld [vmem:[%s3354_s3 + $0x8] sm:$0xff]  }
  0x56   : > { %3161 = vsyncadd (%p4229_p2), [#allocation9], 4294967040  ;;  %v839_v1 = vsel %vm837_vm0, 4294967295, %v3186_v0  ;;  %v2987_v4 = vld [vmem:[#allocation8 + $0x8] sm:$0x3f]   ;;  %2788 = vmatprep.subr.bf16.mxu0 %v2986_v2  ;;  %2920 = vmatprep.subr.bf16.mxu1 %v2986_v2  ;;  %v2988_v5 = vld [vmem:[%s3354_s3] sm:$0xff]  }
  0x57   : > { %v840_v3 = vsel %vm838_vm1, %v839_v1, 0  ;;  %2789 = vmatpush3.bf16.msra.mxu0 %v2986_v2  ;;  %2922 = vmatpush3.bf16.msra.mxu1 %v2986_v2  ;;  %v2990_v7 = vld [vmem:[%s3354_s3 + $0x100] sm:$0xff]   ;;  %v2991_v9 = vld [vmem:[%s3354_s3 + $0x108] sm:$0xff]   ;;  %v2992_v10 = vld [vmem:[%s3354_s3 + $0x10] sm:$0xff]   ;;  %vm1389_vm3 = vcmask 523264   ;;  %vm1685_vm4 = vcmask 516096  }
  0x58   : > { %v842_v6 = vand.u32 %v2987_v4, %v840_v3  ;;  %2792 = vmatprep.mubr.msk.bf16.mxu0 %vm644_vm2, %v2988_v5  ;;  %2856 = vmatprep.mubr.msk.bf16.mxu1 %vm644_vm2, %v2990_v7  ;;  %v2994_v11 = vld [vmem:[%s3354_s3 + $0x110] sm:$0xff]   ;;  %v2993_v12 = vld [vmem:[%s3354_s3 + $0x18] sm:$0xff]   ;;  %v2996_v14 = vld [vmem:[%s3354_s3 + $0x20] sm:$0xff]   ;;  %s3187_s15 = smov 64   ;;  %s2557_s17 = sshll.u32 %s3350_s19, 7 }
  0x59   : > { %v2995_v13 = vld [vmem:[%s3354_s3 + $0x118] sm:$0xff]   ;;  %v2998_v15 = vld [vmem:[%s3354_s3 + $0x120] sm:$0xff]   ;;  %v2997_v16 = vld [vmem:[%s3354_s3 + $0x28] sm:$0xff]   ;;  %s4038_s4 = scalar_lea.vmem [#allocation10], %s2557_s17  ;;  %s2721_s5 = sshll.u32 %s3226_s13, 11 }
  0x5a   : > { %2790 = vmatprep.subr.bf16.mxu0 %v842_v6  ;;  %2921 = vmatprep.subr.bf16.mxu1 %v842_v6  ;;  %v2999_v17 = vld [vmem:[%s3354_s3 + $0x128] sm:$0xff]   ;;  %v3000_v18 = vld [vmem:[%s3354_s3 + $0x30] sm:$0xff]   ;;  %v3001_v20 = vld [vmem:[%s3354_s3 + $0x38] sm:$0xff]   ;;  %s2463_s27 = sshll.u32 %s4038_s4, 4  ;;  %s4163_s28 = scalar_lea.hbm %s4215_s2, %s2721_s5  ;;  %s4165_s27 = int_to_ptr.vmem [resolvable:$true] %s2463_s27 }
  0x5b   : > { %2791 = vmatpush3.bf16.msra.mxu0 %v842_v6  ;;  %2923 = vmatpush3.bf16.msra.mxu1 %v842_v6  ;;  %v3002_v19 = vld [vmem:[%s3354_s3 + $0x130] sm:$0xff]   ;;  %v3003_v21 = vld [vmem:[%s3354_s3 + $0x138] sm:$0xff]   ;;  %v3004_v22 = vld [vmem:[%s3354_s3 + $0x40] sm:$0xff]   ;;  %s2449_s6 = scalar_lea.sflag [#allocation7], %s3350_s19  ;;  %s3110_s7 = scalar_lea.vmem %s4165_s27, 2048 }
  0x5c   : > { %v3006_v23 = vld [vmem:[%s3354_s3 + $0x140] sm:$0xff]   ;;  %v3005_v24 = vld [vmem:[%s3354_s3 + $0x48] sm:$0xff]   ;;  %v3008_v26 = vld [vmem:[%s3354_s3 + $0x50] sm:$0xff]   ;;  %p3111_p4 = scmp.ne.s32.totalorder %s4165_s27, %s3110_s7  ;;  %s3188_s13 = smov [#allocation10]  }
  0x5d   : > { %v3007_v25 = vld [vmem:[%s3354_s3 + $0x148] sm:$0xff]   ;;  %v3010_v27 = vld [vmem:[%s3354_s3 + $0x150] sm:$0xff]   ;;  %v3009_v28 = vld [vmem:[%s3354_s3 + $0x58] sm:$0xff]   ;;  %s3114_s20 = sshll.u32 %s3188_s13, 4  ;;  %s3115_s20 = int_to_ptr.vmem [resolvable:$false] %s3114_s20 }
  0x5e   : > { %2793 = vmatmul.mubr.msk.bf16.vlgmr.msra.gmra.mrb[0].mxu0 %vm644_vm2, %v2989_v8  ;;  %2857 = vmatmul.mubr.msk.bf16.vlgmr.msra.gmra.mrb[0].mxu1 %vm644_vm2, %v2991_v9  ;;  %v3011_v29 = vld [vmem:[%s3354_s3 + $0x158] sm:$0xff]   ;;  %v3012_v30 = vld [vmem:[%s3354_s3 + $0x60] sm:$0xff]   ;;  %v3013_v32 = vld [vmem:[%s3354_s3 + $0x68] sm:$0xff]   ;;  %p3112_p6 = pnand %p3111_p4, %p3299_p12  ;;  %s3116_s18 = scalar_lea.vmem %s3115_s20, 4096 }
  0x5f   : > { %2796 = vmatprep.mubr.msk.bf16.mxu0 %vm644_vm2, %v2992_v10  ;;  %2860 = vmatprep.mubr.msk.bf16.mxu1 %vm644_vm2, %v2994_v11  ;;  %v3014_v31 = vld [vmem:[%s3354_s3 + $0x160] sm:$0xff]   ;;  %v3015_v33 = vld [vmem:[%s3354_s3 + $0x168] sm:$0xff]   ;;  %v3016_v34 = vld [vmem:[%s3354_s3 + $0x70] sm:$0xff]   ;;  %p3117_p10 = scmp.lt.s32.totalorder %s4165_s27, %s3115_s20  ;;  %p3118_p13 = scmp.lt.s32.totalorder %s3116_s18, %s3110_s7 }
  0x60   : > { %v3018_v35 = vld [vmem:[%s3354_s3 + $0x170] sm:$0xff]   ;;  %v3017_v36 = vld [vmem:[%s3354_s3 + $0x78] sm:$0xff]   ;;  %v3020_v38 = vld [vmem:[%s3354_s3 + $0x80] sm:$0xff]   ;;  %p3113_p8 = pneg %p3112_p6 }
  0x61   : > { %v3019_v37 = vld [vmem:[%s3354_s3 + $0x178] sm:$0xff]   ;;  %v3022_v39 = vld [vmem:[%s3354_s3 + $0x180] sm:$0xff]   ;;  %v3021_v40 = vld [vmem:[%s3354_s3 + $0x88] sm:$0xff]   ;;  %p3119_p3 = por %p3118_p13, %p3117_p10 }
  0x62   : > { %v3023_v41 = vld [vmem:[%s3354_s3 + $0x188] sm:$0xff]   ;;  %v3024_v42 = vld [vmem:[%s3354_s3 + $0x90] sm:$0xff]   ;;  %v3025_v44 = vld [vmem:[%s3354_s3 + $0x98] sm:$0xff]  }
  0x63   : > { %v3026_v43 = vld [vmem:[%s3354_s3 + $0x190] sm:$0xff]   ;;  %v3027_v45 = vld [vmem:[%s3354_s3 + $0x198] sm:$0xff]   ;;  %v3028_v46 = vld [vmem:[%s3354_s3 + $0xa0] sm:$0xff]   ;;  %p3120_p7 = pnand %p3119_p3, %p3113_p8 }
  0x64   : > { %v3030_v47 = vld [vmem:[%s3354_s3 + $0x1a0] sm:$0xff]   ;;  %v3029_v48 = vld [vmem:[%s3354_s3 + $0xa8] sm:$0xff]   ;;  %v3032_v50 = vld [vmem:[%s3354_s3 + $0xb0] sm:$0xff]  }
  0x65   : > { %v3031_v49 = vld [vmem:[%s3354_s3 + $0x1a8] sm:$0xff]   ;;  %v3034_v51 = vld [vmem:[%s3354_s3 + $0x1b0] sm:$0xff]   ;;  %v3033_v52 = vld [vmem:[%s3354_s3 + $0xb8] sm:$0xff]  }
  0x66   : > { %2797 = vmatmul.mubr.msk.bf16.gmra.mrb[4].mxu0 %vm644_vm2, %v2993_v12  ;;  %2861 = vmatmul.mubr.msk.bf16.gmra.mrb[4].mxu1 %vm644_vm2, %v2995_v13  ;;  %v3035_v53 = vld [vmem:[%s3354_s3 + $0x1b8] sm:$0xff]   ;;  %v3036_v54 = vld [vmem:[%s3354_s3 + $0xc0] sm:$0xff]   ;;  %v3037_v56 = vld [vmem:[%s3354_s3 + $0xc8] sm:$0xff]  }
  0x67   : > { %2800 = vmatprep.mubr.msk.bf16.mxu0 %vm644_vm2, %v2996_v14  ;;  %2864 = vmatprep.mubr.msk.bf16.mxu1 %vm644_vm2, %v2998_v15  ;;  %v3038_v55 = vld [vmem:[%s3354_s3 + $0x1c0] sm:$0xff]   ;;  %v3039_v57 = vld [vmem:[%s3354_s3 + $0x1c8] sm:$0xff]   ;;  %v3040_v58 = vld [vmem:[%s3354_s3 + $0xd0] sm:$0xff]  }
  0x68   : > { %v3042_v59 = vld [vmem:[%s3354_s3 + $0x1d0] sm:$0xff]   ;;  %v3041_v60 = vld [vmem:[%s3354_s3 + $0xd8] sm:$0xff]   ;;  %v3044_v62 = vld [vmem:[%s3354_s3 + $0xe0] sm:$0xff]  }
  0x69   : > { %v3043_v61 = vld [vmem:[%s3354_s3 + $0x1d8] sm:$0xff]   ;;  %v3046_v63 = vld [vmem:[%s3354_s3 + $0x1e0] sm:$0xff]   ;;  %v3045_v0 = vld [vmem:[%s3354_s3 + $0xe8] sm:$0xff]  }
  0x6a   : > { %v3047_v1 = vld [vmem:[%s3354_s3 + $0x1e8] sm:$0xff]   ;;  %v3048_v2 = vld [vmem:[%s3354_s3 + $0xf0] sm:$0xff]   ;;  %v3049_v4 = vld [vmem:[%s3354_s3 + $0xf8] sm:$0xff]  }
  0x6b   : > { %v3050_v3 = vld [vmem:[%s3354_s3 + $0x1f0] sm:$0xff]   ;;  %v3051_v5 = vld [vmem:[%s3354_s3 + $0x1f8] sm:$0xff]  }
  0x6e   : > { %2801 = vmatmul.mubr.msk.bf16.gmra.mrb[8].mxu0 %vm644_vm2, %v2997_v16  ;;  %2865 = vmatmul.mubr.msk.bf16.gmra.mrb[8].mxu1 %vm644_vm2, %v2999_v17 }
  0x6f   : > { %2804 = vmatprep.mubr.msk.bf16.mxu0 %vm644_vm2, %v3000_v18  ;;  %2868 = vmatprep.mubr.msk.bf16.mxu1 %vm644_vm2, %v3002_v19 }
  0x76   : > { %2805 = vmatmul.mubr.msk.bf16.gmra.mrb[12].mxu0 %vm644_vm2, %v3001_v20  ;;  %2869 = vmatmul.mubr.msk.bf16.gmra.mrb[12].mxu1 %vm644_vm2, %v3003_v21 }
  0x77   : > { %2808 = vmatprep.mubr.msk.bf16.mxu0 %vm644_vm2, %v3004_v22  ;;  %2872 = vmatprep.mubr.msk.bf16.mxu1 %vm644_vm2, %v3006_v23 }
  0x7e   : > { %2809 = vmatmul.mubr.msk.bf16.gmra.mrb[16].mxu0 %vm644_vm2, %v3005_v24  ;;  %2873 = vmatmul.mubr.msk.bf16.gmra.mrb[16].mxu1 %vm644_vm2, %v3007_v25 }
  0x7f   : > { %2812 = vmatprep.mubr.msk.bf16.mxu0 %vm644_vm2, %v3008_v26  ;;  %2876 = vmatprep.mubr.msk.bf16.mxu1 %vm644_vm2, %v3010_v27 }
  0x86   : > { %2813 = vmatmul.mubr.msk.bf16.gmra.mrb[20].mxu0 %vm644_vm2, %v3009_v28  ;;  %2877 = vmatmul.mubr.msk.bf16.gmra.mrb[20].mxu1 %vm644_vm2, %v3011_v29 }
  0x87   : > { %2816 = vmatprep.mubr.msk.bf16.mxu0 %vm644_vm2, %v3012_v30  ;;  %2880 = vmatprep.mubr.msk.bf16.mxu1 %vm644_vm2, %v3014_v31 }
  0x8e   : > { %2817 = vmatmul.mubr.msk.bf16.gmra.mrb[24].mxu0 %vm644_vm2, %v3013_v32  ;;  %2881 = vmatmul.mubr.msk.bf16.gmra.mrb[24].mxu1 %vm644_vm2, %v3015_v33 }
  0x8f   : > { %2820 = vmatprep.mubr.msk.bf16.mxu0 %vm644_vm2, %v3016_v34  ;;  %2884 = vmatprep.mubr.msk.bf16.mxu1 %vm644_vm2, %v3018_v35 }
  0x96   : > { %2821 = vmatmul.mubr.msk.bf16.gmra.mrb[28].mxu0 %vm644_vm2, %v3017_v36  ;;  %2885 = vmatmul.mubr.msk.bf16.gmra.mrb[28].mxu1 %vm644_vm2, %v3019_v37 }
  0x97   : > { %2824 = vmatprep.mubr.msk.bf16.mxu0 %vm644_vm2, %v3020_v38  ;;  %2888 = vmatprep.mubr.msk.bf16.mxu1 %vm644_vm2, %v3022_v39 }
  0x9e   : > { %2825 = vmatmul.mubr.msk.bf16.gmra.mrb[32].mxu0 %vm644_vm2, %v3021_v40  ;;  %2889 = vmatmul.mubr.msk.bf16.gmra.mrb[32].mxu1 %vm644_vm2, %v3023_v41 }
  0x9f   : > { %2828 = vmatprep.mubr.msk.bf16.mxu0 %vm644_vm2, %v3024_v42  ;;  %2892 = vmatprep.mubr.msk.bf16.mxu1 %vm644_vm2, %v3026_v43 }
  0xa6   : > { %2829 = vmatmul.mubr.msk.bf16.gmra.mrb[36].mxu0 %vm644_vm2, %v3025_v44  ;;  %2893 = vmatmul.mubr.msk.bf16.gmra.mrb[36].mxu1 %vm644_vm2, %v3027_v45 }
  0xa7   : > { %2832 = vmatprep.mubr.msk.bf16.mxu0 %vm644_vm2, %v3028_v46  ;;  %2896 = vmatprep.mubr.msk.bf16.mxu1 %vm644_vm2, %v3030_v47 }
  0xae   : > { %2833 = vmatmul.mubr.msk.bf16.gmra.mrb[40].mxu0 %vm644_vm2, %v3029_v48  ;;  %2897 = vmatmul.mubr.msk.bf16.gmra.mrb[40].mxu1 %vm644_vm2, %v3031_v49 }
  0xaf   : > { %2836 = vmatprep.mubr.msk.bf16.mxu0 %vm644_vm2, %v3032_v50  ;;  %2900 = vmatprep.mubr.msk.bf16.mxu1 %vm644_vm2, %v3034_v51 }
  0xb6   : > { %2837 = vmatmul.mubr.msk.bf16.gmra.mrb[44].mxu0 %vm644_vm2, %v3033_v52  ;;  %2901 = vmatmul.mubr.msk.bf16.gmra.mrb[44].mxu1 %vm644_vm2, %v3035_v53 }
  0xb7   : > { %2840 = vmatprep.mubr.msk.bf16.mxu0 %vm644_vm2, %v3036_v54  ;;  %2904 = vmatprep.mubr.msk.bf16.mxu1 %vm644_vm2, %v3038_v55 }
  0xbe   : > { %2841 = vmatmul.mubr.msk.bf16.gmra.mrb[48].mxu0 %vm644_vm2, %v3037_v56  ;;  %2905 = vmatmul.mubr.msk.bf16.gmra.mrb[48].mxu1 %vm644_vm2, %v3039_v57 }
  0xbf   : > { %2844 = vmatprep.mubr.msk.bf16.mxu0 %vm644_vm2, %v3040_v58  ;;  %2908 = vmatprep.mubr.msk.bf16.mxu1 %vm644_vm2, %v3042_v59 }
  0xc6   : > { %2845 = vmatmul.mubr.msk.bf16.gmra.mrb[52].mxu0 %vm644_vm2, %v3041_v60  ;;  %2909 = vmatmul.mubr.msk.bf16.gmra.mrb[52].mxu1 %vm644_vm2, %v3043_v61 }
  0xc7   : > { %2848 = vmatprep.mubr.msk.bf16.mxu0 %vm644_vm2, %v3044_v62  ;;  %2912 = vmatprep.mubr.msk.bf16.mxu1 %vm644_vm2, %v3046_v63 }
  0xce   : > { %2849 = vmatmul.mubr.msk.bf16.gmra.mrb[56].mxu0 %vm644_vm2, %v3045_v0  ;;  %2913 = vmatmul.mubr.msk.bf16.gmra.mrb[56].mxu1 %vm644_vm2, %v3047_v1 }
  0xcf   : > { %2852 = vmatprep.mubr.msk.bf16.mxu0 %vm644_vm2, %v3048_v2  ;;  %2916 = vmatprep.mubr.msk.bf16.mxu1 %vm644_vm2, %v3050_v3 }
  0xd6   : > { %2853 = vmatmul.mubr.msk.bf16.gmra.mrb[60].mxu0 %vm644_vm2, %v3049_v4  ;;  %2917 = vmatmul.mubr.msk.bf16.gmra.mrb[60].mxu1 %vm644_vm2, %v3051_v5 }
 0x131   : > { %v2794_v6 = vpop.f32.mrb[0].mxu0  ;;  %v2858_v7 = vpop.f32.mrb[0].mxu1 }
 0x132   : > { %1392 = vst.msk [vmem:[#allocation2 + $0x10] sm:$0xff] %vm1389_vm3, %v2794_v6  ;;  %v878_v8 = vpop.f32.mrb[1].mxu0  ;;  %1456 = vst.msk [vmem:[#allocation2 + $0x210] sm:$0xff] %vm1389_vm3, %v2858_v7  ;;  %v1134_v9 = vpop.f32.mrb[1].mxu1 }
 0x133   : > { %1390 = vst.msk [vmem:[#allocation2] sm:$0xff] %vm1389_vm3, %v878_v8  ;;  %v2795_v10 = vpop.f32.mrb[2].mxu0  ;;  %1454 = vst.msk [vmem:[#allocation2 + $0x200] sm:$0xff] %vm1389_vm3, %v1134_v9  ;;  %v2859_v11 = vpop.f32.mrb[2].mxu1 }
 0x134   : > { %1393 = vst.msk [vmem:[#allocation2 + $0x18] sm:$0xff] %vm1389_vm3, %v2795_v10  ;;  %v881_v12 = vpop.f32.mrb[3].mxu0  ;;  %1457 = vst.msk [vmem:[#allocation2 + $0x218] sm:$0xff] %vm1389_vm3, %v2859_v11  ;;  %v1137_v13 = vpop.f32.mrb[3].mxu1 }
 0x135   : > { %1391 = vst.msk [vmem:[#allocation2 + $0x8] sm:$0xff] %vm1389_vm3, %v881_v12  ;;  %1455 = vst.msk [vmem:[#allocation2 + $0x208] sm:$0xff] %vm1389_vm3, %v1137_v13 }
 0x139   : > { %v1520_v14 = vld [vmem:[#allocation2 + $0x10] sm:$0xff]  ;;  %v2798_v15 = vpop.f32.mrb[4].mxu0  ;;  %v2862_v16 = vpop.f32.mrb[4].mxu1 }
 0x13a   : > { %v1518_v17 = vld [vmem:[#allocation2] sm:$0xff]  ;;  %1396 = vst.msk [vmem:[#allocation2 + $0x30] sm:$0xff] %vm1389_vm3, %v2798_v15  ;;  %v894_v18 = vpop.f32.mrb[5].mxu0  ;;  %1460 = vst.msk [vmem:[#allocation2 + $0x230] sm:$0xff] %vm1389_vm3, %v2862_v16  ;;  %v1150_v19 = vpop.f32.mrb[5].mxu1 }
 0x13b   : > { %v1550_v20 = vmax.f32 %v1518_v17, %v1520_v14  ;;  %v1521_v21 = vld [vmem:[#allocation2 + $0x18] sm:$0xff]  ;;  %1394 = vst.msk [vmem:[#allocation2 + $0x20] sm:$0xff] %vm1389_vm3, %v894_v18  ;;  %v2799_v22 = vpop.f32.mrb[6].mxu0  ;;  %1458 = vst.msk [vmem:[#allocation2 + $0x220] sm:$0xff] %vm1389_vm3, %v1150_v19  ;;  %v2863_v23 = vpop.f32.mrb[6].mxu1 }
 0x13c   : > { %v1519_v24 = vld [vmem:[#allocation2 + $0x8] sm:$0xff]  ;;  %1397 = vst.msk [vmem:[#allocation2 + $0x38] sm:$0xff] %vm1389_vm3, %v2799_v22  ;;  %v897_v25 = vpop.f32.mrb[7].mxu0  ;;  %1461 = vst.msk [vmem:[#allocation2 + $0x238] sm:$0xff] %vm1389_vm3, %v2863_v23  ;;  %v1153_v26 = vpop.f32.mrb[7].mxu1 }
 0x13d   : > { %v1566_v27 = vmax.f32 %v1550_v20, %v1518_v17  ;;  %v1551_v28 = vmax.f32 %v1519_v24, %v1521_v21  ;;  %1395 = vst.msk [vmem:[#allocation2 + $0x28] sm:$0xff] %vm1389_vm3, %v897_v25  ;;  %1459 = vst.msk [vmem:[#allocation2 + $0x228] sm:$0xff] %vm1389_vm3, %v1153_v26 }
 0x13f   : > { %1582 = vst.msk [vmem:[#allocation3] sm:$0xff] %vm1389_vm3, %v1566_v27  ;;  %v1567_v29 = vmax.f32 %v1551_v28, %v1519_v24 }
 0x141   : > { %1583 = vst.msk [vmem:[#allocation3 + $0x8] sm:$0xff] %vm1389_vm3, %v1567_v29  ;;  %v1524_v30 = vld [vmem:[#allocation2 + $0x30] sm:$0xff]  ;;  %v2802_v31 = vpop.f32.mrb[8].mxu0  ;;  %v2866_v32 = vpop.f32.mrb[8].mxu1 }
 0x142   : > { %v1522_v33 = vld [vmem:[#allocation2 + $0x20] sm:$0xff]  ;;  %1400 = vst.msk [vmem:[#allocation2 + $0x50] sm:$0xff] %vm1389_vm3, %v2802_v31  ;;  %v910_v34 = vpop.f32.mrb[9].mxu0  ;;  %1464 = vst.msk [vmem:[#allocation2 + $0x250] sm:$0xff] %vm1389_vm3, %v2866_v32  ;;  %v1166_v35 = vpop.f32.mrb[9].mxu1 }
 0x143   : > { %v1552_v36 = vmax.f32 %v1522_v33, %v1524_v30  ;;  %v1525_v37 = vld [vmem:[#allocation2 + $0x38] sm:$0xff]  ;;  %1398 = vst.msk [vmem:[#allocation2 + $0x40] sm:$0xff] %vm1389_vm3, %v910_v34  ;;  %v2803_v38 = vpop.f32.mrb[10].mxu0  ;;  %1462 = vst.msk [vmem:[#allocation2 + $0x240] sm:$0xff] %vm1389_vm3, %v1166_v35  ;;  %v2867_v39 = vpop.f32.mrb[10].mxu1 }
 0x144   : > { %v1523_v40 = vld [vmem:[#allocation2 + $0x28] sm:$0xff]  ;;  %1401 = vst.msk [vmem:[#allocation2 + $0x58] sm:$0xff] %vm1389_vm3, %v2803_v38  ;;  %v913_v41 = vpop.f32.mrb[11].mxu0  ;;  %1465 = vst.msk [vmem:[#allocation2 + $0x258] sm:$0xff] %vm1389_vm3, %v2867_v39  ;;  %v1169_v42 = vpop.f32.mrb[11].mxu1 }
 0x145   : > { %v1568_v43 = vmax.f32 %v1552_v36, %v1520_v14  ;;  %v1553_v44 = vmax.f32 %v1523_v40, %v1525_v37  ;;  %1399 = vst.msk [vmem:[#allocation2 + $0x48] sm:$0xff] %vm1389_vm3, %v913_v41  ;;  %1463 = vst.msk [vmem:[#allocation2 + $0x248] sm:$0xff] %vm1389_vm3, %v1169_v42 }
 0x146   : > { %v1661_v48 = vld [vmem:[#allocation3] sm:$0x1]  ;;  %v1669_v54 = vld [vmem:[#allocation3 + $0x1] sm:$0x1] }
 0x147   : > { %1584 = vst.msk [vmem:[#allocation3 + $0x10] sm:$0xff] %vm1389_vm3, %v1568_v43  ;;  %v1569_v45 = vmax.f32 %v1553_v44, %v1521_v21  ;;  %v1677_v2 = vmax.f32 %v1661_v48, %v1669_v54 }
 0x148   : > { %v1598_v46 = vld [vmem:[#allocation3] ss:$2 sm:$0xff]  ;;  %v1614_v47 = vld [vmem:[#allocation3 + $0x1] ss:$2 sm:$0xff] }
 0x149   : > { %1585 = vst.msk [vmem:[#allocation3 + $0x18] sm:$0xff] %vm1389_vm3, %v1569_v45  ;;  %v1528_v49 = vld [vmem:[#allocation2 + $0x50] sm:$0xff]  ;;  %v2806_v50 = vpop.f32.mrb[12].mxu0  ;;  %v2870_v51 = vpop.f32.mrb[12].mxu1  ;;  %v1629_v52 = vrot.slane %v1614_v47, 7  ;;  %v1637_v53 = vmax.f32 %v1598_v46, %v1614_v47 }
 0x14a   : > { %v1526_v55 = vld [vmem:[#allocation2 + $0x40] sm:$0xff]  ;;  %1404 = vst.msk [vmem:[#allocation2 + $0x70] sm:$0xff] %vm1389_vm3, %v2806_v50  ;;  %v926_v56 = vpop.f32.mrb[13].mxu0  ;;  %1468 = vst.msk [vmem:[#allocation2 + $0x270] sm:$0xff] %vm1389_vm3, %v2870_v51  ;;  %v1182_v57 = vpop.f32.mrb[13].mxu1 }
 0x14b   : > { %v1554_v58 = vmax.f32 %v1526_v55, %v1528_v49  ;;  %v1529_v59 = vld [vmem:[#allocation2 + $0x58] sm:$0xff]  ;;  %1402 = vst.msk [vmem:[#allocation2 + $0x60] sm:$0xff] %vm1389_vm3, %v926_v56  ;;  %v2807_v60 = vpop.f32.mrb[14].mxu0  ;;  %1466 = vst.msk [vmem:[#allocation2 + $0x260] sm:$0xff] %vm1389_vm3, %v1182_v57  ;;  %v2871_v61 = vpop.f32.mrb[14].mxu1  ;;  %v1645_v62 = vmax.f32 %v1637_v53, %v1629_v52 }
 0x14c   : > { %v1527_v63 = vld [vmem:[#allocation2 + $0x48] sm:$0xff]  ;;  %1405 = vst.msk [vmem:[#allocation2 + $0x78] sm:$0xff] %vm1389_vm3, %v2807_v60  ;;  %v929_v0 = vpop.f32.mrb[15].mxu0  ;;  %1469 = vst.msk [vmem:[#allocation2 + $0x278] sm:$0xff] %vm1389_vm3, %v2871_v61  ;;  %v1185_v1 = vpop.f32.mrb[15].mxu1 }
 0x14d   : > { %v1570_v3 = vmax.f32 %v1554_v58, %v1524_v30  ;;  %v1555_v4 = vmax.f32 %v1527_v63, %v1529_v59  ;;  %1403 = vst.msk [vmem:[#allocation2 + $0x68] sm:$0xff] %vm1389_vm3, %v929_v0  ;;  %1467 = vst.msk [vmem:[#allocation2 + $0x268] sm:$0xff] %vm1389_vm3, %v1185_v1 }
 0x14e   : > { %1653 = vst.msk [vmem:[#allocation4] sm:$0xff] %vm1389_vm3, %v1645_v62  ;;  %v1662_v8 = vld [vmem:[#allocation3 + $0x10] sm:$0x1]  ;;  %v1670_v14 = vld [vmem:[#allocation3 + $0x11] sm:$0x1] }
 0x14f   : > { %1686 = vst.msk [vmem:[#allocation4] sm:$0x1] %vm1685_vm4, %v1677_v2  ;;  %v1571_v5 = vmax.f32 %v1555_v4, %v1525_v37  ;;  %v1678_v26 = vmax.f32 %v1662_v8, %v1670_v14 }
 0x150   : > { %1586 = vst.msk [vmem:[#allocation3 + $0x20] sm:$0xff] %vm1389_vm3, %v1570_v3  ;;  %v1600_v6 = vld [vmem:[#allocation3 + $0x10] ss:$2 sm:$0xff]  ;;  %v1616_v7 = vld [vmem:[#allocation3 + $0x11] ss:$2 sm:$0xff] }
 0x151   : > { %1587 = vst.msk [vmem:[#allocation3 + $0x28] sm:$0xff] %vm1389_vm3, %v1571_v5  ;;  %v3532_v9 = vld [vmem:[#allocation2 + $0x70] sm:$0xff]  ;;  %v2810_v10 = vpop.f32.mrb[16].mxu0  ;;  %v2874_v11 = vpop.f32.mrb[16].mxu1  ;;  %v1630_v12 = vrot.slane %v1616_v7, 7  ;;  %v1638_v13 = vmax.f32 %v1600_v6, %v1616_v7 }
 0x152   : > { %v1530_v15 = vld [vmem:[#allocation2 + $0x60] sm:$0xff]  ;;  %1408 = vst.msk [vmem:[#allocation2 + $0x90] sm:$0xff] %vm1389_vm3, %v2810_v10  ;;  %v942_v16 = vpop.f32.mrb[17].mxu0  ;;  %1472 = vst.msk [vmem:[#allocation2 + $0x290] sm:$0xff] %vm1389_vm3, %v2874_v11  ;;  %v1198_v17 = vpop.f32.mrb[17].mxu1 }
 0x153   : > { %v1556_v18 = vmax.f32 %v1530_v15, %v3532_v9  ;;  %v1533_v19 = vld [vmem:[#allocation2 + $0x78] sm:$0xff]  ;;  %1406 = vst.msk [vmem:[#allocation2 + $0x80] sm:$0xff] %vm1389_vm3, %v942_v16  ;;  %v2811_v20 = vpop.f32.mrb[18].mxu0  ;;  %1470 = vst.msk [vmem:[#allocation2 + $0x280] sm:$0xff] %vm1389_vm3, %v1198_v17  ;;  %v2875_v21 = vpop.f32.mrb[18].mxu1  ;;  %v1646_v22 = vmax.f32 %v1638_v13, %v1630_v12 }
 0x154   : > { %v1531_v23 = vld [vmem:[#allocation2 + $0x68] sm:$0xff]  ;;  %1409 = vst.msk [vmem:[#allocation2 + $0x98] sm:$0xff] %vm1389_vm3, %v2811_v20  ;;  %v945_v24 = vpop.f32.mrb[19].mxu0  ;;  %1473 = vst.msk [vmem:[#allocation2 + $0x298] sm:$0xff] %vm1389_vm3, %v2875_v21  ;;  %v1201_v29 = vpop.f32.mrb[19].mxu1 }
 0x155   : > { %v1710_v25 = vld [vmem:[#allocation4 + $0x1] ss:$2 sm:$0xf]  ;;  %v1572_v27 = vmax.f32 %v1556_v18, %v1528_v49  ;;  %v1557_v28 = vmax.f32 %v1531_v23, %v1533_v19  ;;  %1407 = vst.msk [vmem:[#allocation2 + $0x88] sm:$0xff] %vm1389_vm3, %v945_v24  ;;  %1654 = vst.msk [vmem:[#allocation4 + $0x8] sm:$0xff] %vm1389_vm3, %v1646_v22 }
 0x156   : > { %1733 = vrot.lane.b32.xlu0 %v1710_v25, %s3187_s15  ;;  %1471 = vst.msk [vmem:[#allocation2 + $0x288] sm:$0xff] %vm1389_vm3, %v1201_v29 }
 0x157   : > { %1687 = vst.msk [vmem:[#allocation4 + $0x8] sm:$0x1] %vm1685_vm4, %v1678_v26  ;;  %v1573_v30 = vmax.f32 %v1557_v28, %v1529_v59  ;;  %v1663_v33 = vld [vmem:[#allocation3 + $0x20] sm:$0x1]  ;;  %v1671_v39 = vld [vmem:[#allocation3 + $0x21] sm:$0x1] }
 0x158   : > { %1588 = vst.msk [vmem:[#allocation3 + $0x30] sm:$0xff] %vm1389_vm3, %v1572_v27  ;;  %v1602_v31 = vld [vmem:[#allocation3 + $0x20] ss:$2 sm:$0xff]  ;;  %v1618_v32 = vld [vmem:[#allocation3 + $0x21] ss:$2 sm:$0xff]  ;;  %v1679_v52 = vmax.f32 %v1663_v33, %v1671_v39 }
 0x159   : > { %1589 = vst.msk [vmem:[#allocation3 + $0x38] sm:$0xff] %vm1389_vm3, %v1573_v30  ;;  %v1536_v34 = vld [vmem:[#allocation2 + $0x90] sm:$0xff]  ;;  %v2814_v35 = vpop.f32.mrb[20].mxu0  ;;  %v2878_v36 = vpop.f32.mrb[20].mxu1  ;;  %v1631_v37 = vrot.slane %v1618_v32, 7  ;;  %v1639_v38 = vmax.f32 %v1602_v31, %v1618_v32 }
 0x15a   : > { %v1534_v40 = vld [vmem:[#allocation2 + $0x80] sm:$0xff]  ;;  %1412 = vst.msk [vmem:[#allocation2 + $0xb0] sm:$0xff] %vm1389_vm3, %v2814_v35  ;;  %v958_v41 = vpop.f32.mrb[21].mxu0  ;;  %1476 = vst.msk [vmem:[#allocation2 + $0x2b0] sm:$0xff] %vm1389_vm3, %v2878_v36  ;;  %v1214_v42 = vpop.f32.mrb[21].mxu1 }
 0x15b   : > { %v1558_v43 = vmax.f32 %v1534_v40, %v1536_v34  ;;  %v1537_v44 = vld [vmem:[#allocation2 + $0x98] sm:$0xff]  ;;  %1410 = vst.msk [vmem:[#allocation2 + $0xa0] sm:$0xff] %vm1389_vm3, %v958_v41  ;;  %v2815_v45 = vpop.f32.mrb[22].mxu0  ;;  %1474 = vst.msk [vmem:[#allocation2 + $0x2a0] sm:$0xff] %vm1389_vm3, %v1214_v42  ;;  %v2879_v46 = vpop.f32.mrb[22].mxu1  ;;  %v1647_v47 = vmax.f32 %v1639_v38, %v1631_v37 }
 0x15c   : > { %v1535_v48 = vld [vmem:[#allocation2 + $0x88] sm:$0xff]  ;;  %1413 = vst.msk [vmem:[#allocation2 + $0xb8] sm:$0xff] %vm1389_vm3, %v2815_v45  ;;  %v961_v49 = vpop.f32.mrb[23].mxu0  ;;  %1477 = vst.msk [vmem:[#allocation2 + $0x2b8] sm:$0xff] %vm1389_vm3, %v2879_v46  ;;  %v1217_v51 = vpop.f32.mrb[23].mxu1 }
 0x15d   : > { %v1712_v50 = vld [vmem:[#allocation4 + $0x9] ss:$2 sm:$0xf]  ;;  %v1574_v53 = vmax.f32 %v1558_v43, %v3532_v9  ;;  %v1559_v54 = vmax.f32 %v1535_v48, %v1537_v44  ;;  %1411 = vst.msk [vmem:[#allocation2 + $0xa8] sm:$0xff] %vm1389_vm3, %v961_v49  ;;  %1475 = vst.msk [vmem:[#allocation2 + $0x2a8] sm:$0xff] %vm1389_vm3, %v1217_v51 }
 0x15e   : > { %1735 = vrot.lane.b32.xlu0 %v1712_v50, %s3187_s15  ;;  %1655 = vst.msk [vmem:[#allocation4 + $0x10] sm:$0xff] %vm1389_vm3, %v1647_v47 }
 0x15f   : > { %1688 = vst.msk [vmem:[#allocation4 + $0x10] sm:$0x1] %vm1685_vm4, %v1679_v52  ;;  %v1575_v55 = vmax.f32 %v1559_v54, %v1533_v19  ;;  %v1664_v58 = vld [vmem:[#allocation3 + $0x30] sm:$0x1]  ;;  %v1672_v0 = vld [vmem:[#allocation3 + $0x31] sm:$0x1] }
 0x160   : > { %1590 = vst.msk [vmem:[#allocation3 + $0x40] sm:$0xff] %vm1389_vm3, %v1574_v53  ;;  %v1604_v56 = vld [vmem:[#allocation3 + $0x30] ss:$2 sm:$0xff]  ;;  %v1620_v57 = vld [vmem:[#allocation3 + $0x31] ss:$2 sm:$0xff]  ;;  %v1680_v12 = vmax.f32 %v1664_v58, %v1672_v0 }
 0x161   : > { %1591 = vst.msk [vmem:[#allocation3 + $0x48] sm:$0xff] %vm1389_vm3, %v1575_v55  ;;  %v3562_v59 = vld [vmem:[#allocation2 + $0xb0] sm:$0xff]  ;;  %v2818_v60 = vpop.f32.mrb[24].mxu0  ;;  %v2882_v61 = vpop.f32.mrb[24].mxu1  ;;  %v1632_v62 = vrot.slane %v1620_v57, 7  ;;  %v1640_v63 = vmax.f32 %v1604_v56, %v1620_v57 }
 0x162   : > { %v1538_v1 = vld [vmem:[#allocation2 + $0xa0] sm:$0xff]  ;;  %1416 = vst.msk [vmem:[#allocation2 + $0xd0] sm:$0xff] %vm1389_vm3, %v2818_v60  ;;  %v974_v2 = vpop.f32.mrb[25].mxu0  ;;  %1480 = vst.msk [vmem:[#allocation2 + $0x2d0] sm:$0xff] %vm1389_vm3, %v2882_v61  ;;  %v1230_v3 = vpop.f32.mrb[25].mxu1 }
 0x163   : > { %v1560_v4 = vmax.f32 %v1538_v1, %v3562_v59  ;;  %v1541_v5 = vld [vmem:[#allocation2 + $0xb8] sm:$0xff]  ;;  %1414 = vst.msk [vmem:[#allocation2 + $0xc0] sm:$0xff] %vm1389_vm3, %v974_v2  ;;  %v2819_v6 = vpop.f32.mrb[26].mxu0  ;;  %1478 = vst.msk [vmem:[#allocation2 + $0x2c0] sm:$0xff] %vm1389_vm3, %v1230_v3  ;;  %v2883_v7 = vpop.f32.mrb[26].mxu1  ;;  %v1648_v8 = vmax.f32 %v1640_v63, %v1632_v62 }
 0x164   : > { %v1539_v9 = vld [vmem:[#allocation2 + $0xa8] sm:$0xff]  ;;  %1417 = vst.msk [vmem:[#allocation2 + $0xd8] sm:$0xff] %vm1389_vm3, %v2819_v6  ;;  %v977_v10 = vpop.f32.mrb[27].mxu0  ;;  %1481 = vst.msk [vmem:[#allocation2 + $0x2d8] sm:$0xff] %vm1389_vm3, %v2883_v7  ;;  %v1233_v15 = vpop.f32.mrb[27].mxu1 }
 0x165   : > { %v1714_v11 = vld [vmem:[#allocation4 + $0x11] ss:$2 sm:$0xf]  ;;  %v1576_v13 = vmax.f32 %v1560_v4, %v1536_v34  ;;  %v1561_v14 = vmax.f32 %v1539_v9, %v1541_v5  ;;  %1415 = vst.msk [vmem:[#allocation2 + $0xc8] sm:$0xff] %vm1389_vm3, %v977_v10  ;;  %1656 = vst.msk [vmem:[#allocation4 + $0x18] sm:$0xff] %vm1389_vm3, %v1648_v8 }
 0x166   : > { %1737 = vrot.lane.b32.xlu1 %v1714_v11, %s3187_s15  ;;  %1479 = vst.msk [vmem:[#allocation2 + $0x2c8] sm:$0xff] %vm1389_vm3, %v1233_v15 }
 0x167   : > { %1689 = vst.msk [vmem:[#allocation4 + $0x18] sm:$0x1] %vm1685_vm4, %v1680_v12  ;;  %v1577_v16 = vmax.f32 %v1561_v14, %v1537_v44  ;;  %v1665_v19 = vld [vmem:[#allocation3 + $0x40] sm:$0x1]  ;;  %v1673_v25 = vld [vmem:[#allocation3 + $0x41] sm:$0x1] }
 0x168   : > { %1592 = vst.msk [vmem:[#allocation3 + $0x50] sm:$0xff] %vm1389_vm3, %v1576_v13  ;;  %v1606_v17 = vld [vmem:[#allocation3 + $0x40] ss:$2 sm:$0xff]  ;;  %v1622_v18 = vld [vmem:[#allocation3 + $0x41] ss:$2 sm:$0xff]  ;;  %v1681_v38 = vmax.f32 %v1665_v19, %v1673_v25 }
 0x169   : > { %1593 = vst.msk [vmem:[#allocation3 + $0x58] sm:$0xff] %vm1389_vm3, %v1577_v16  ;;  %v1544_v20 = vld [vmem:[#allocation2 + $0xd0] sm:$0xff]  ;;  %v2822_v21 = vpop.f32.mrb[28].mxu0  ;;  %v2886_v22 = vpop.f32.mrb[28].mxu1  ;;  %v1633_v23 = vrot.slane %v1622_v18, 7  ;;  %v1641_v24 = vmax.f32 %v1606_v17, %v1622_v18 }
 0x16a   : > { %v1542_v26 = vld [vmem:[#allocation2 + $0xc0] sm:$0xff]  ;;  %1420 = vst.msk [vmem:[#allocation2 + $0xf0] sm:$0xff] %vm1389_vm3, %v2822_v21  ;;  %v990_v27 = vpop.f32.mrb[29].mxu0  ;;  %1484 = vst.msk [vmem:[#allocation2 + $0x2f0] sm:$0xff] %vm1389_vm3, %v2886_v22  ;;  %v1246_v28 = vpop.f32.mrb[29].mxu1 }
 0x16b   : > { %v1562_v29 = vmax.f32 %v1542_v26, %v1544_v20  ;;  %v1545_v30 = vld [vmem:[#allocation2 + $0xd8] sm:$0xff]  ;;  %1418 = vst.msk [vmem:[#allocation2 + $0xe0] sm:$0xff] %vm1389_vm3, %v990_v27  ;;  %v2823_v31 = vpop.f32.mrb[30].mxu0  ;;  %1482 = vst.msk [vmem:[#allocation2 + $0x2e0] sm:$0xff] %vm1389_vm3, %v1246_v28  ;;  %v2887_v32 = vpop.f32.mrb[30].mxu1  ;;  %v1649_v33 = vmax.f32 %v1641_v24, %v1633_v23  ;;  %v3621_v27 = vld [vmem:[#allocation2 + $0x210] sm:$0xff] }
 0x16c   : > { %v1543_v34 = vld [vmem:[#allocation2 + $0xc8] sm:$0xff]  ;;  %1421 = vst.msk [vmem:[#allocation2 + $0xf8] sm:$0xff] %vm1389_vm3, %v2823_v31  ;;  %v993_v35 = vpop.f32.mrb[31].mxu0  ;;  %v1716_v36 = vld [vmem:[#allocation4 + $0x19] ss:$2 sm:$0xf] }
 0x16d   : > { %1485 = vst.msk [vmem:[#allocation2 + $0x2f8] sm:$0xff] %vm1389_vm3, %v2887_v32  ;;  %v1249_v37 = vpop.f32.mrb[31].mxu1  ;;  %v1578_v39 = vmax.f32 %v1562_v29, %v3562_v59  ;;  %v1563_v40 = vmax.f32 %v1543_v34, %v1545_v30  ;;  %1419 = vst.msk [vmem:[#allocation2 + $0xe8] sm:$0xff] %vm1389_vm3, %v993_v35  ;;  %1739 = vrot.lane.b32.xlu1 %v1716_v36, %s3187_s15  ;;  %v1998_v28 = vld [vmem:[#allocation2 + $0x200] sm:$0xff]  ;;  %v3624_v29 = vld [vmem:[#allocation2 + $0x218] sm:$0xff] }
 0x16e   : > { %1483 = vst.msk [vmem:[#allocation2 + $0x2e8] sm:$0xff] %vm1389_vm3, %v1249_v37  ;;  %1657 = vst.msk [vmem:[#allocation4 + $0x20] sm:$0xff] %vm1389_vm3, %v1649_v33 }
 0x16f   : > { %1690 = vst.msk [vmem:[#allocation4 + $0x20] sm:$0x1] %vm1685_vm4, %v1681_v38  ;;  %v1579_v41 = vmax.f32 %v1563_v40, %v1541_v5  ;;  %v1666_v44 = vld [vmem:[#allocation3 + $0x50] sm:$0x1]  ;;  %v1674_v50 = vld [vmem:[#allocation3 + $0x51] sm:$0x1] }
 0x170   : > { %1594 = vst.msk [vmem:[#allocation3 + $0x60] sm:$0xff] %vm1389_vm3, %v1578_v39  ;;  %v1608_v42 = vld [vmem:[#allocation3 + $0x50] ss:$2 sm:$0xff]  ;;  %v1624_v43 = vld [vmem:[#allocation3 + $0x51] ss:$2 sm:$0xff]  ;;  %v1682_v62 = vmax.f32 %v1666_v44, %v1674_v50  ;;  %v2030_v44 = vmax.f32 %v1998_v28, %v3621_v27 }
 0x171   : > { %1595 = vst.msk [vmem:[#allocation3 + $0x68] sm:$0xff] %vm1389_vm3, %v1579_v41  ;;  %v1548_v45 = vld [vmem:[#allocation2 + $0xf0] sm:$0xff]  ;;  %v2826_v46 = vpop.f32.mrb[32].mxu0  ;;  %v2890_v47 = vpop.f32.mrb[32].mxu1  ;;  %v1634_v48 = vrot.slane %v1624_v43, 7  ;;  %v1642_v49 = vmax.f32 %v1608_v42, %v1624_v43 }
 0x172   : > { %v1546_v51 = vld [vmem:[#allocation2 + $0xe0] sm:$0xff]  ;;  %1424 = vst.msk [vmem:[#allocation2 + $0x110] sm:$0xff] %vm1389_vm3, %v2826_v46  ;;  %v1006_v52 = vpop.f32.mrb[33].mxu0  ;;  %1488 = vst.msk [vmem:[#allocation2 + $0x310] sm:$0xff] %vm1389_vm3, %v2890_v47  ;;  %v1262_v53 = vpop.f32.mrb[33].mxu1 }
 0x173   : > { %v1564_v54 = vmax.f32 %v1546_v51, %v1548_v45  ;;  %v1549_v55 = vld [vmem:[#allocation2 + $0xf8] sm:$0xff]  ;;  %1422 = vst.msk [vmem:[#allocation2 + $0x100] sm:$0xff] %vm1389_vm3, %v1006_v52  ;;  %v2827_v56 = vpop.f32.mrb[34].mxu0  ;;  %1486 = vst.msk [vmem:[#allocation2 + $0x300] sm:$0xff] %vm1389_vm3, %v1262_v53  ;;  %v2891_v57 = vpop.f32.mrb[34].mxu1  ;;  %v1650_v58 = vmax.f32 %v1642_v49, %v1634_v48 }
 0x174   : > { %v1547_v59 = vld [vmem:[#allocation2 + $0xe8] sm:$0xff]  ;;  %1425 = vst.msk [vmem:[#allocation2 + $0x118] sm:$0xff] %vm1389_vm3, %v2827_v56  ;;  %v1009_v60 = vpop.f32.mrb[35].mxu0  ;;  %1489 = vst.msk [vmem:[#allocation2 + $0x318] sm:$0xff] %vm1389_vm3, %v2891_v57  ;;  %v1265_v1 = vpop.f32.mrb[35].mxu1 }
 0x175   : > { %v1718_v61 = vld [vmem:[#allocation4 + $0x21] ss:$2 sm:$0xf]  ;;  %v1580_v63 = vmax.f32 %v1564_v54, %v1544_v20  ;;  %v1565_v0 = vmax.f32 %v1547_v59, %v1549_v55  ;;  %1423 = vst.msk [vmem:[#allocation2 + $0x108] sm:$0xff] %vm1389_vm3, %v1009_v60  ;;  %1658 = vst.msk [vmem:[#allocation4 + $0x28] sm:$0xff] %vm1389_vm3, %v1650_v58  ;;  %v2046_v58 = vmax.f32 %v2030_v44, %v1998_v28 }
 0x176   : > { %1741 = vrot.lane.b32.xlu0 %v1718_v61, %s3187_s15  ;;  %1487 = vst.msk [vmem:[#allocation2 + $0x308] sm:$0xff] %vm1389_vm3, %v1265_v1 }
 0x177   : > { %1691 = vst.msk [vmem:[#allocation4 + $0x28] sm:$0x1] %vm1685_vm4, %v1682_v62  ;;  %v1581_v2 = vmax.f32 %v1565_v0, %v1545_v30  ;;  %v1667_v5 = vld [vmem:[#allocation3 + $0x60] sm:$0x1]  ;;  %v1675_v11 = vld [vmem:[#allocation3 + $0x61] sm:$0x1] }
 0x178   : > { %1596 = vst.msk [vmem:[#allocation3 + $0x70] sm:$0xff] %vm1389_vm3, %v1580_v63  ;;  %v1610_v3 = vld [vmem:[#allocation3 + $0x60] ss:$2 sm:$0xff]  ;;  %v1626_v4 = vld [vmem:[#allocation3 + $0x61] ss:$2 sm:$0xff]  ;;  %v1683_v24 = vmax.f32 %v1667_v5, %v1675_v11 }
 0x179   : > { %1597 = vst.msk [vmem:[#allocation3 + $0x78] sm:$0xff] %vm1389_vm3, %v1581_v2  ;;  %v3605_v6 = vld [vmem:[#allocation2 + $0x110] sm:$0xff]  ;;  %v2830_v7 = vpop.f32.mrb[36].mxu0  ;;  %v2894_v8 = vpop.f32.mrb[36].mxu1  ;;  %v1635_v9 = vrot.slane %v1626_v4, 7  ;;  %v1643_v10 = vmax.f32 %v1610_v3, %v1626_v4  ;;  %v1999_v30 = vld [vmem:[#allocation2 + $0x208] sm:$0xff] }
 0x17a   : > { %v1773_v12 = vld [vmem:[#allocation2 + $0x100] sm:$0xff]  ;;  %1428 = vst.msk [vmem:[#allocation2 + $0x130] sm:$0xff] %vm1389_vm3, %v2830_v7  ;;  %v1022_v13 = vpop.f32.mrb[37].mxu0  ;;  %1492 = vst.msk [vmem:[#allocation2 + $0x330] sm:$0xff] %vm1389_vm3, %v2894_v8  ;;  %v1278_v14 = vpop.f32.mrb[37].mxu1  ;;  %v2031_v45 = vmax.f32 %v1999_v30, %v3624_v29  ;;  %v3652_v3 = vld [vmem:[#allocation2 + $0x230] sm:$0xff] }
 0x17b   : > { %v1805_v15 = vmax.f32 %v1773_v12, %v3605_v6  ;;  %v3610_v16 = vld [vmem:[#allocation2 + $0x118] sm:$0xff]  ;;  %1426 = vst.msk [vmem:[#allocation2 + $0x120] sm:$0xff] %vm1389_vm3, %v1022_v13  ;;  %v2831_v17 = vpop.f32.mrb[38].mxu0  ;;  %1490 = vst.msk [vmem:[#allocation2 + $0x320] sm:$0xff] %vm1389_vm3, %v1278_v14  ;;  %v2895_v18 = vpop.f32.mrb[38].mxu1  ;;  %v1651_v19 = vmax.f32 %v1643_v10, %v1635_v9  ;;  %v3654_v4 = vld [vmem:[#allocation2 + $0x220] sm:$0xff] }
 0x17c   : > { %v1774_v20 = vld [vmem:[#allocation2 + $0x108] sm:$0xff]  ;;  %1429 = vst.msk [vmem:[#allocation2 + $0x138] sm:$0xff] %vm1389_vm3, %v2831_v17  ;;  %v1025_v21 = vpop.f32.mrb[39].mxu0  ;;  %1493 = vst.msk [vmem:[#allocation2 + $0x338] sm:$0xff] %vm1389_vm3, %v2895_v18  ;;  %v1281_v23 = vpop.f32.mrb[39].mxu1  ;;  %v2047_v59 = vmax.f32 %v2031_v45, %v1999_v30  ;;  %v3650_v61 = vld [vmem:[#allocation2 + $0x318] sm:$0xff] }
 0x17d   : > { %v1720_v22 = vld [vmem:[#allocation4 + $0x29] ss:$2 sm:$0xf]  ;;  %v1821_v25 = vmax.f32 %v1805_v15, %v1773_v12  ;;  %v1806_v26 = vmax.f32 %v1774_v20, %v3610_v16  ;;  %1427 = vst.msk [vmem:[#allocation2 + $0x128] sm:$0xff] %vm1389_vm3, %v1025_v21  ;;  %1491 = vst.msk [vmem:[#allocation2 + $0x328] sm:$0xff] %vm1389_vm3, %v1281_v23  ;;  %v3656_v5 = vld [vmem:[#allocation2 + $0x310] sm:$0xff] }
 0x17e   : > { %1743 = vrot.lane.b32.xlu1 %v1720_v22, %s3187_s15  ;;  %1659 = vst.msk [vmem:[#allocation4 + $0x30] sm:$0xff] %vm1389_vm3, %v1651_v19  ;;  %v2224_v62 = vld [vmem:[#allocation2 + $0x308] sm:$0xff]  ;;  %v3663_v12 = vld [vmem:[#allocation2 + $0x238] sm:$0xff]  ;;  %v3673_v22 = vld [vmem:[#allocation4] ss:$2 sm:$0xf] }
 0x17f   : > { %1692 = vst.msk [vmem:[#allocation4 + $0x30] sm:$0x1] %vm1685_vm4, %v1683_v24  ;;  %v1822_v31 = vmax.f32 %v1806_v26, %v1774_v20  ;;  %v1668_v34 = vld [vmem:[#allocation3 + $0x70] sm:$0x1]  ;;  %v1676_v40 = vld [vmem:[#allocation3 + $0x71] sm:$0x1]  ;;  %v2256_v17 = vmax.f32 %v2224_v62, %v3650_v61 }
 0x180   : > { %1837 = vst.msk [vmem:[#allocation3] sm:$0xff] %vm1389_vm3, %v1821_v25  ;;  %v1612_v32 = vld [vmem:[#allocation3 + $0x70] ss:$2 sm:$0xff]  ;;  %v1628_v33 = vld [vmem:[#allocation3 + $0x71] ss:$2 sm:$0xff]  ;;  %v1684_v54 = vmax.f32 %v1668_v34, %v1676_v40  ;;  %v2003_v13 = vld [vmem:[#allocation2 + $0x228] sm:$0xff]  ;;  %v2032_v34 = vmax.f32 %v3654_v4, %v3652_v3 }
 0x181   : > { %1838 = vst.msk [vmem:[#allocation3 + $0x8] sm:$0xff] %vm1389_vm3, %v1822_v31  ;;  %v3628_v35 = vld [vmem:[#allocation2 + $0x130] sm:$0xff]  ;;  %v2834_v36 = vpop.f32.mrb[40].mxu0  ;;  %v2898_v37 = vpop.f32.mrb[40].mxu1  ;;  %v1636_v38 = vrot.slane %v1628_v33, 7  ;;  %v1644_v39 = vmax.f32 %v1612_v32, %v1628_v33  ;;  %v2272_v40 = vmax.f32 %v2256_v17, %v2224_v62 }
 0x182   : > { %v1777_v41 = vld [vmem:[#allocation2 + $0x120] sm:$0xff]  ;;  %1432 = vst.msk [vmem:[#allocation2 + $0x150] sm:$0xff] %vm1389_vm3, %v2834_v36  ;;  %v1038_v42 = vpop.f32.mrb[41].mxu0  ;;  %1496 = vst.msk [vmem:[#allocation2 + $0x350] sm:$0xff] %vm1389_vm3, %v2898_v37  ;;  %v1294_v43 = vpop.f32.mrb[41].mxu1  ;;  %v2033_v36 = vmax.f32 %v2003_v13, %v3663_v12  ;;  %v3687_v37 = vld [vmem:[#allocation2 + $0x250] sm:$0xff] }
 0x183   : > { %v1807_v46 = vmax.f32 %v1777_v41, %v3628_v35  ;;  %v3635_v47 = vld [vmem:[#allocation2 + $0x138] sm:$0xff]  ;;  %1430 = vst.msk [vmem:[#allocation2 + $0x140] sm:$0xff] %vm1389_vm3, %v1038_v42  ;;  %v2835_v48 = vpop.f32.mrb[42].mxu0  ;;  %1494 = vst.msk [vmem:[#allocation2 + $0x340] sm:$0xff] %vm1389_vm3, %v1294_v43  ;;  %v2899_v49 = vpop.f32.mrb[42].mxu1  ;;  %v1652_v50 = vmax.f32 %v1644_v39, %v1636_v38  ;;  %v2007_v39 = vld [vmem:[#allocation2 + $0x248] sm:$0xff] }
 0x184   : > { %v1778_v51 = vld [vmem:[#allocation2 + $0x128] sm:$0xff]  ;;  %1433 = vst.msk [vmem:[#allocation2 + $0x158] sm:$0xff] %vm1389_vm3, %v2835_v48  ;;  %v1041_v52 = vpop.f32.mrb[43].mxu0  ;;  %1497 = vst.msk [vmem:[#allocation2 + $0x358] sm:$0xff] %vm1389_vm3, %v2899_v49  ;;  %v1297_v57 = vpop.f32.mrb[43].mxu1  ;;  %v3690_v38 = vld [vmem:[#allocation2 + $0x258] sm:$0xff] }
 0x185   : > { %v1722_v53 = vld [vmem:[#allocation4 + $0x31] ss:$2 sm:$0xf]  ;;  %v1823_v55 = vmax.f32 %v1807_v46, %v3605_v6  ;;  %v1808_v56 = vmax.f32 %v1778_v51, %v3635_v47  ;;  %1431 = vst.msk [vmem:[#allocation2 + $0x148] sm:$0xff] %vm1389_vm3, %v1041_v52  ;;  %1660 = vst.msk [vmem:[#allocation4 + $0x38] sm:$0xff] %vm1389_vm3, %v1652_v50  ;;  %v2223_v6 = vld [vmem:[#allocation2 + $0x300] sm:$0xff]  ;;  %v2035_v62 = vmax.f32 %v2007_v39, %v3690_v38 }
 0x186   : > { %1745 = vrot.lane.b32.xlu0 %v1722_v53, %s3187_s15  ;;  %1495 = vst.msk [vmem:[#allocation2 + $0x348] sm:$0xff] %vm1389_vm3, %v1297_v57  ;;  %v2255_v24 = vmax.f32 %v2223_v6, %v3656_v5  ;;  %v2227_v13 = vld [vmem:[#allocation2 + $0x320] sm:$0xff] }
 0x187   : > { %1693 = vst.msk [vmem:[#allocation4 + $0x38] sm:$0x1] %vm1685_vm4, %v1684_v54  ;;  %v1824_v60 = vmax.f32 %v1808_v56, %v3610_v16  ;;  %v1901_v63 = vld [vmem:[#allocation3] sm:$0x1]  ;;  %v1909_v2 = vld [vmem:[#allocation3 + $0x1] sm:$0x1]  ;;  %v2049_v54 = vmax.f32 %v2033_v36, %v3624_v29 }
 0x188   : > { %1839 = vst.msk [vmem:[#allocation3 + $0x10] sm:$0xff] %vm1389_vm3, %v1823_v55  ;;  %v1853_v0 = vld [vmem:[#allocation3] ss:$2 sm:$0xff]  ;;  %v1861_v1 = vld [vmem:[#allocation3 + $0x1] ss:$2 sm:$0xff]  ;;  %v1917_v31 = vmax.f32 %v1901_v63, %v1909_v2  ;;  %v2271_v42 = vmax.f32 %v2255_v24, %v2223_v6  ;;  %v3704_v55 = vld [vmem:[#allocation2 + $0x338] sm:$0xff]  ;;  %v2051_v24 = vmax.f32 %v2035_v62, %v3663_v12 }
 0x189   : > { %1840 = vst.msk [vmem:[#allocation3 + $0x18] sm:$0xff] %vm1389_vm3, %v1824_v60  ;;  %v3659_v7 = vld [vmem:[#allocation2 + $0x150] sm:$0xff]  ;;  %v2838_v8 = vpop.f32.mrb[44].mxu0  ;;  %v2902_v9 = vpop.f32.mrb[44].mxu1  ;;  %v1869_v10 = vrot.slane %v1861_v1, 7  ;;  %v1877_v11 = vmax.f32 %v1853_v0, %v1861_v1  ;;  %2062 = vst.msk [vmem:[#allocation3] sm:$0xff] %vm1389_vm3, %v2046_v58 }
 0x18a   : > { %2063 = vst.msk [vmem:[#allocation3 + $0x8] sm:$0xff] %vm1389_vm3, %v2047_v59  ;;  %v1781_v14 = vld [vmem:[#allocation2 + $0x140] sm:$0xff]  ;;  %1436 = vst.msk [vmem:[#allocation2 + $0x170] sm:$0xff] %vm1389_vm3, %v2838_v8  ;;  %v1054_v15 = vpop.f32.mrb[45].mxu0  ;;  %v1310_v16 = vpop.f32.mrb[45].mxu1  ;;  %v2228_v63 = vld [vmem:[#allocation2 + $0x328] sm:$0xff] }
 0x18b   : > { %1500 = vst.msk [vmem:[#allocation2 + $0x370] sm:$0xff] %vm1389_vm3, %v2902_v9  ;;  %v1809_v18 = vmax.f32 %v1781_v14, %v3659_v7  ;;  %v3669_v19 = vld [vmem:[#allocation2 + $0x158] sm:$0xff]  ;;  %1434 = vst.msk [vmem:[#allocation2 + $0x160] sm:$0xff] %vm1389_vm3, %v1054_v15  ;;  %v2839_v20 = vpop.f32.mrb[46].mxu0  ;;  %v2903_v21 = vpop.f32.mrb[46].mxu1  ;;  %v1885_v23 = vmax.f32 %v1877_v11, %v1869_v10  ;;  %v3719_v11 = vld [vmem:[#allocation2 + $0x330] sm:$0xff] }
 0x18c   : > { %1498 = vst.msk [vmem:[#allocation2 + $0x360] sm:$0xff] %vm1389_vm3, %v1310_v16  ;;  %v1782_v25 = vld [vmem:[#allocation2 + $0x148] sm:$0xff]  ;;  %1437 = vst.msk [vmem:[#allocation2 + $0x178] sm:$0xff] %vm1389_vm3, %v2839_v20  ;;  %v1057_v26 = vpop.f32.mrb[47].mxu0  ;;  %v1313_v30 = vpop.f32.mrb[47].mxu1  ;;  %v2258_v20 = vmax.f32 %v2228_v63, %v3704_v55 }
 0x18d   : > { %v1724_v28 = vld [vmem:[#allocation4 + $0x39] ss:$2 sm:$0xf]  ;;  %1501 = vst.msk [vmem:[#allocation2 + $0x378] sm:$0xff] %vm1389_vm3, %v2903_v21  ;;  %v1825_v32 = vmax.f32 %v1809_v18, %v3628_v35  ;;  %v1810_v33 = vmax.f32 %v1782_v25, %v3669_v19  ;;  %1435 = vst.msk [vmem:[#allocation2 + $0x168] sm:$0xff] %vm1389_vm3, %v1057_v26  ;;  %v2006_v35 = vld [vmem:[#allocation2 + $0x240] sm:$0xff] }
 0x18e   : > { %1747 = vrot.lane.b32.xlu1 %v1724_v28, %s3187_s15  ;;  %1499 = vst.msk [vmem:[#allocation2 + $0x368] sm:$0xff] %vm1389_vm3, %v1313_v30  ;;  %1893 = vst.msk [vmem:[#allocation4] sm:$0xff] %vm1389_vm3, %v1885_v23  ;;  %v2034_v60 = vmax.f32 %v2006_v35, %v3687_v37  ;;  %v3732_v25 = vld [vmem:[#allocation2 + $0x358] sm:$0xff]  ;;  %v3734_v26 = vld [vmem:[#allocation2 + $0x348] sm:$0xff] }
 0x18f   : > { %1925 = vst.msk [vmem:[#allocation4] sm:$0x1] %vm1685_vm4, %v1917_v31  ;;  %v1826_v41 = vmax.f32 %v1810_v33, %v3635_v47  ;;  %v3698_v52 = vld [vmem:[#allocation3 + $0x10] sm:$0x1]  ;;  %v3700_v53 = vld [vmem:[#allocation3 + $0x11] sm:$0x1]  ;;  %v2048_v47 = vmax.f32 %v2032_v34, %v3621_v27 }
 0x190   : > { %1841 = vst.msk [vmem:[#allocation3 + $0x20] sm:$0xff] %vm1389_vm3, %v1825_v32  ;;  %v2126_v45 = vld [vmem:[#allocation3] sm:$0x1]  ;;  %v2134_v51 = vld [vmem:[#allocation3 + $0x1] sm:$0x1] }
 0x191   : > { %v2078_v43 = vld [vmem:[#allocation3] ss:$2 sm:$0xff]  ;;  %v2086_v44 = vld [vmem:[#allocation3 + $0x1] ss:$2 sm:$0xff]  ;;  %1842 = vst.msk [vmem:[#allocation3 + $0x28] sm:$0xff] %vm1389_vm3, %v1826_v41  ;;  %v3695_v46 = vld [vmem:[#allocation2 + $0x170] sm:$0xff]  ;;  %v2142_v16 = vmax.f32 %v2126_v45, %v2134_v51  ;;  %v2260_v45 = vmax.f32 %v3734_v26, %v3732_v25 }
 0x192   : > { %v2842_v48 = vpop.f32.mrb[48].mxu0  ;;  %v2094_v49 = vrot.slane %v2086_v44, 7  ;;  %v2102_v50 = vmax.f32 %v2078_v43, %v2086_v44  ;;  %2288 = vst.msk [vmem:[#allocation3 + $0x8] sm:$0xff] %vm1389_vm3, %v2272_v40  ;;  %v1785_v56 = vld [vmem:[#allocation2 + $0x160] sm:$0xff]  ;;  %2287 = vst.msk [vmem:[#allocation3] sm:$0xff] %vm1389_vm3, %v2271_v42  ;;  %v2906_v58 = vpop.f32.mrb[48].mxu1  ;;  %v2274_v43 = vmax.f32 %v2258_v20, %v3650_v61 }
 0x193   : > { %1440 = vst.msk [vmem:[#allocation2 + $0x190] sm:$0xff] %vm1389_vm3, %v2842_v48  ;;  %v1070_v57 = vpop.f32.mrb[49].mxu0  ;;  %v1854_v59 = vld [vmem:[#allocation3 + $0x10] ss:$2 sm:$0xff]  ;;  %v1811_v0 = vmax.f32 %v1785_v56, %v3695_v46  ;;  %1504 = vst.msk [vmem:[#allocation2 + $0x390] sm:$0xff] %vm1389_vm3, %v2906_v58  ;;  %v1326_v2 = vpop.f32.mrb[49].mxu1 }
 0x194   : > { %v3711_v27 = vld [vmem:[#allocation2 + $0x178] sm:$0xff]  ;;  %1438 = vst.msk [vmem:[#allocation2 + $0x180] sm:$0xff] %vm1389_vm3, %v1070_v57  ;;  %v2843_v29 = vpop.f32.mrb[50].mxu0  ;;  %v2110_v1 = vmax.f32 %v2102_v50, %v2094_v49  ;;  %v1786_v6 = vld [vmem:[#allocation2 + $0x168] sm:$0xff]  ;;  %1502 = vst.msk [vmem:[#allocation2 + $0x380] sm:$0xff] %vm1389_vm3, %v1326_v2  ;;  %v2907_v18 = vpop.f32.mrb[50].mxu1 }
 0x195   : > { %v1862_v4 = vld [vmem:[#allocation3 + $0x11] ss:$2 sm:$0xff]  ;;  %1441 = vst.msk [vmem:[#allocation2 + $0x198] sm:$0xff] %vm1389_vm3, %v2843_v29  ;;  %v1073_v8 = vpop.f32.mrb[51].mxu0  ;;  %v1827_v14 = vmax.f32 %v1811_v0, %v3659_v7  ;;  %v1812_v15 = vmax.f32 %v1786_v6, %v3711_v27  ;;  %1505 = vst.msk [vmem:[#allocation2 + $0x398] sm:$0xff] %vm1389_vm3, %v2907_v18  ;;  %v1329_v21 = vpop.f32.mrb[51].mxu1  ;;  %v2050_v7 = vmax.f32 %v2034_v60, %v3652_v3 }
 0x196   : > { %v1941_v9 = vld [vmem:[#allocation4 + $0x1] ss:$2 sm:$0xf]  ;;  %v1878_v10 = vmax.f32 %v1854_v59, %v1862_v4  ;;  %2064 = vst.msk [vmem:[#allocation3 + $0x10] sm:$0xff] %vm1389_vm3, %v2048_v47  ;;  %2065 = vst.msk [vmem:[#allocation3 + $0x18] sm:$0xff] %vm1389_vm3, %v2049_v54  ;;  %v1870_v23 = vrot.slane %v1862_v4, 7  ;;  %v2257_v3 = vmax.f32 %v2227_v13, %v3719_v11 }
 0x197   : > { %1439 = vst.msk [vmem:[#allocation2 + $0x188] sm:$0xff] %vm1389_vm3, %v1073_v8  ;;  %1957 = vrot.lane.b32.xlu0 %v1941_v9, %s3187_s15  ;;  %v3725_v17 = vld [vmem:[#allocation4] ss:$2 sm:$0xf]  ;;  %1843 = vst.msk [vmem:[#allocation3 + $0x30] sm:$0xff] %vm1389_vm3, %v1827_v14  ;;  %v1828_v28 = vmax.f32 %v1812_v15, %v3669_v19  ;;  %v1918_v19 = vmax.f32 %v3698_v52, %v3700_v53  ;;  %v3753_v44 = vld [vmem:[#allocation2 + $0x350] sm:$0xff] }
 0x198   : > { %2118 = vst.msk [vmem:[#allocation4] sm:$0xff] %vm1389_vm3, %v2110_v1  ;;  %1503 = vst.msk [vmem:[#allocation2 + $0x388] sm:$0xff] %vm1389_vm3, %v1329_v21  ;;  %v3740_v30 = vld [vmem:[#allocation4 + $0x8] ss:$2 sm:$0xf]  ;;  %v1886_v32 = vmax.f32 %v1878_v10, %v1870_v23  ;;  %v2231_v53 = vld [vmem:[#allocation2 + $0x340] sm:$0xff]  ;;  %v2273_v60 = vmax.f32 %v2257_v3, %v3656_v5  ;;  %v2276_v23 = vmax.f32 %v2260_v45, %v3704_v55 }
 0x199   : > { %2150 = vst.msk [vmem:[#allocation4] sm:$0x1] %vm1685_vm4, %v2142_v16  ;;  %v3742_v31 = vld [vmem:[#allocation3 + $0x20] sm:$0x1]  ;;  %v1863_v33 = vld [vmem:[#allocation3 + $0x21] ss:$2 sm:$0xff]  ;;  %v2259_v15 = vmax.f32 %v2231_v53, %v3753_v44 }
 0x19a   : > { %v1855_v12 = vld [vmem:[#allocation3 + $0x20] ss:$2 sm:$0xff]  ;;  %v1911_v34 = vld [vmem:[#allocation3 + $0x21] sm:$0x1]  ;;  %1844 = vst.msk [vmem:[#allocation3 + $0x38] sm:$0xff] %vm1389_vm3, %v1828_v28  ;;  %v3746_v36 = vld [vmem:[#allocation2 + $0x190] sm:$0xff] }
 0x19b   : > { %v2846_v35 = vpop.f32.mrb[52].mxu0  ;;  %v2910_v39 = vpop.f32.mrb[52].mxu1  ;;  %v2303_v40 = vld [vmem:[#allocation3] ss:$2 sm:$0xff]  ;;  %v1871_v41 = vrot.slane %v1863_v33, 7  ;;  %v1879_v42 = vmax.f32 %v1855_v12, %v1863_v33  ;;  %2066 = vst.msk [vmem:[#allocation3 + $0x20] sm:$0xff] %vm1389_vm3, %v2050_v7  ;;  %v1919_v1 = vmax.f32 %v3742_v31, %v1911_v34 }
 0x19c   : > { %2067 = vst.msk [vmem:[#allocation3 + $0x28] sm:$0xff] %vm1389_vm3, %v2051_v24  ;;  %v1789_v48 = vld [vmem:[#allocation2 + $0x180] sm:$0xff]  ;;  %1444 = vst.msk [vmem:[#allocation2 + $0x1b0] sm:$0xff] %vm1389_vm3, %v2846_v35  ;;  %v1086_v49 = vpop.f32.mrb[53].mxu0  ;;  %v1342_v51 = vpop.f32.mrb[53].mxu1  ;;  %v3763_v47 = vld [vmem:[#allocation2 + $0x198] sm:$0xff]  ;;  %v2275_v35 = vmax.f32 %v2259_v15, %v3719_v11 }
 0x19d   : > { %1894 = vst.msk [vmem:[#allocation4 + $0x8] sm:$0xff] %vm1389_vm3, %v1886_v32  ;;  %1508 = vst.msk [vmem:[#allocation2 + $0x3b0] sm:$0xff] %vm1389_vm3, %v2910_v39  ;;  %v2311_v50 = vld [vmem:[#allocation3 + $0x1] ss:$2 sm:$0xff]  ;;  %v1813_v61 = vmax.f32 %v1789_v48, %v3746_v36  ;;  %v2847_v54 = vpop.f32.mrb[54].mxu0  ;;  %v1887_v59 = vmax.f32 %v1879_v42, %v1871_v41  ;;  %v3771_v2 = vld [vmem:[#allocation2 + $0x270] sm:$0xff] }
 0x19e   : > { %v3760_v52 = vld [vmem:[#allocation4 + $0x10] ss:$2 sm:$0xf]  ;;  %1442 = vst.msk [vmem:[#allocation2 + $0x1a0] sm:$0xff] %vm1389_vm3, %v1086_v49  ;;  %v2319_v57 = vrot.slane %v2311_v50, 7  ;;  %v2327_v58 = vmax.f32 %v2303_v40, %v2311_v50  ;;  %1506 = vst.msk [vmem:[#allocation2 + $0x3a0] sm:$0xff] %vm1389_vm3, %v1342_v51 }
 0x19f   : > { %v2079_v56 = vld [vmem:[#allocation3 + $0x10] ss:$2 sm:$0xff]  ;;  %1926 = vst.msk [vmem:[#allocation4 + $0x8] sm:$0x1] %vm1685_vm4, %v1918_v19  ;;  %v1790_v62 = vld [vmem:[#allocation2 + $0x188] sm:$0xff]  ;;  %v1089_v63 = vpop.f32.mrb[55].mxu0  ;;  %v1829_v4 = vmax.f32 %v1813_v61, %v3695_v46 }
 0x1a0   : > { %1445 = vst.msk [vmem:[#allocation2 + $0x1b8] sm:$0xff] %vm1389_vm3, %v2847_v54  ;;  %v2087_v0 = vld [vmem:[#allocation3 + $0x11] ss:$2 sm:$0xff]  ;;  %v2127_v29 = vld [vmem:[#allocation3 + $0x10] sm:$0x1]  ;;  %v1814_v6 = vmax.f32 %v1790_v62, %v3763_v47  ;;  %1443 = vst.msk [vmem:[#allocation2 + $0x1a8] sm:$0xff] %vm1389_vm3, %v1089_v63  ;;  %v2335_v46 = vmax.f32 %v2327_v58, %v2319_v57 }
 0x1a1   : > { %v2095_v8 = vrot.slane %v2087_v0, 7  ;;  %v2103_v9 = vmax.f32 %v2079_v56, %v2087_v0  ;;  %v2135_v10 = vld [vmem:[#allocation3 + $0x11] sm:$0x1]  ;;  %2290 = vst.msk [vmem:[#allocation3 + $0x18] sm:$0xff] %vm1389_vm3, %v2274_v43  ;;  %v2911_v5 = vpop.f32.mrb[54].mxu1  ;;  %1895 = vst.msk [vmem:[#allocation4 + $0x10] sm:$0xff] %vm1389_vm3, %v1887_v59 }
 0x1a2   : > { %v3778_v13 = vld [vmem:[#allocation2 + $0x260] sm:$0xff]  ;;  %v3780_v14 = vld [vmem:[#allocation2 + $0x278] sm:$0xff]  ;;  %2289 = vst.msk [vmem:[#allocation3 + $0x10] sm:$0xff] %vm1389_vm3, %v2273_v60  ;;  %1509 = vst.msk [vmem:[#allocation2 + $0x3b8] sm:$0xff] %vm1389_vm3, %v2911_v5  ;;  %v1345_v18 = vpop.f32.mrb[55].mxu1  ;;  %v1830_v7 = vmax.f32 %v1814_v6, %v3711_v27  ;;  %v2850_v27 = vpop.f32.mrb[56].mxu0  ;;  %v2143_v39 = vmax.f32 %v2127_v29, %v2135_v10 }
 0x1a3   : > { %v3783_v16 = vld [vmem:[#allocation4] ss:$2 sm:$0xf]  ;;  %1927 = vst.msk [vmem:[#allocation4 + $0x10] sm:$0x1] %vm1685_vm4, %v1919_v1  ;;  %v3788_v20 = vld [vmem:[#allocation2 + $0x268] sm:$0xff]  ;;  %v2111_v24 = vmax.f32 %v2103_v9, %v2095_v8  ;;  %v2036_v34 = vmax.f32 %v3778_v13, %v3771_v2 }
 0x1a4   : > { %v3790_v21 = vld [vmem:[#allocation2 + $0x298] sm:$0xff]  ;;  %1845 = vst.msk [vmem:[#allocation3 + $0x40] sm:$0xff] %vm1389_vm3, %v1829_v4  ;;  %v2166_v26 = vld [vmem:[#allocation4 + $0x1] ss:$2 sm:$0xf]  ;;  %1507 = vst.msk [vmem:[#allocation2 + $0x3a8] sm:$0xff] %vm1389_vm3, %v1345_v18  ;;  %v2037_v42 = vmax.f32 %v3788_v20, %v3780_v14 }
 0x1a5   : > { %2182 = vrot.lane.b32.xlu0 %v2166_v26, %s3187_s15  ;;  %2343 = vst.msk [vmem:[#allocation4] sm:$0xff] %vm1389_vm3, %v2335_v46  ;;  %v2080_v28 = vld [vmem:[#allocation3 + $0x20] ss:$2 sm:$0xff]  ;;  %v2088_v31 = vld [vmem:[#allocation3 + $0x21] ss:$2 sm:$0xff]  ;;  %1846 = vst.msk [vmem:[#allocation3 + $0x48] sm:$0xff] %vm1389_vm3, %v1830_v7  ;;  %v2052_v29 = vmax.f32 %v2036_v34, %v3687_v37 }
 0x1a6   : > { %v3798_v3 = vld [vmem:[#allocation3 + $0x20] sm:$0x1]  ;;  %v3800_v32 = vld [vmem:[#allocation2 + $0x288] sm:$0xff]  ;;  %v3803_v55 = vld [vmem:[#allocation2 + $0x1b0] sm:$0xff]  ;;  %v2104_v33 = vmax.f32 %v2080_v28, %v2088_v31  ;;  %2292 = vst.msk [vmem:[#allocation3 + $0x28] sm:$0xff] %vm1389_vm3, %v2276_v23  ;;  %v1102_v41 = vpop.f32.mrb[57].mxu0  ;;  %v2053_v10 = vmax.f32 %v2037_v42, %v3690_v38 }
 0x1a7   : > { %v1942_v12 = vld [vmem:[#allocation4 + $0x9] ss:$2 sm:$0xf]  ;;  %v1793_v19 = vld [vmem:[#allocation2 + $0x1a0] sm:$0xff]  ;;  %1448 = vst.msk [vmem:[#allocation2 + $0x1d0] sm:$0xff] %vm1389_vm3, %v2850_v27  ;;  %v3816_v45 = vld [vmem:[#allocation2 + $0x1b8] sm:$0xff]  ;;  %v2039_v51 = vmax.f32 %v3800_v32, %v3790_v21 }
 0x1a8   : > { %1959 = vrot.lane.b32.xlu1 %v1942_v12, %s3187_s15  ;;  %v3810_v40 = vld [vmem:[#allocation4 + $0x8] ss:$2 sm:$0xf]  ;;  %v1815_v43 = vmax.f32 %v1793_v19, %v3803_v55  ;;  %1446 = vst.msk [vmem:[#allocation2 + $0x1c0] sm:$0xff] %vm1389_vm3, %v1102_v41  ;;  %v2851_v11 = vpop.f32.mrb[58].mxu0  ;;  %v2096_v48 = vrot.slane %v2088_v31, 7 }
 0x1a9   : > { %2119 = vst.msk [vmem:[#allocation4 + $0x8] sm:$0xff] %vm1389_vm3, %v2111_v24  ;;  %v2136_v49 = vld [vmem:[#allocation3 + $0x21] sm:$0x1]  ;;  %v2914_v50 = vpop.f32.mrb[56].mxu1  ;;  %v1794_v53 = vld [vmem:[#allocation2 + $0x1a8] sm:$0xff]  ;;  %1449 = vst.msk [vmem:[#allocation2 + $0x1d8] sm:$0xff] %vm1389_vm3, %v2851_v11  ;;  %v2055_v38 = vmax.f32 %v2039_v51, %v3780_v14 }
 0x1aa   : > { %2151 = vst.msk [vmem:[#allocation4 + $0x8] sm:$0x1] %vm1685_vm4, %v2143_v39  ;;  %v1105_v61 = vpop.f32.mrb[59].mxu0  ;;  %v1943_v54 = vld [vmem:[#allocation4 + $0x11] ss:$2 sm:$0xf]  ;;  %v1831_v59 = vmax.f32 %v1815_v43, %v3746_v36  ;;  %v1816_v60 = vmax.f32 %v1794_v53, %v3816_v45  ;;  %v2112_v62 = vmax.f32 %v2104_v33, %v2096_v48  ;;  %v2144_v4 = vmax.f32 %v3798_v3, %v2136_v49 }
 0x1ab   : > { %2291 = vst.msk [vmem:[#allocation3 + $0x20] sm:$0xff] %vm1389_vm3, %v2275_v35  ;;  %1512 = vst.msk [vmem:[#allocation2 + $0x3d0] sm:$0xff] %vm1389_vm3, %v2914_v50  ;;  %v1358_v56 = vpop.f32.mrb[57].mxu1  ;;  %v3826_v57 = vld [vmem:[#allocation2 + $0x290] sm:$0xff]  ;;  %v3828_v58 = vld [vmem:[#allocation2 + $0x280] sm:$0xff]  ;;  %1961 = vrot.lane.b32.xlu0 %v1943_v54, %s3187_s15  ;;  %v2854_v31 = vpop.f32.mrb[60].mxu0 }
 0x1ac   : > { %1447 = vst.msk [vmem:[#allocation2 + $0x1c8] sm:$0xff] %vm1389_vm3, %v1105_v61  ;;  %v3834_v63 = vld [vmem:[#allocation4 + $0x10] ss:$2 sm:$0xf]  ;;  %1510 = vst.msk [vmem:[#allocation2 + $0x3c0] sm:$0xff] %vm1389_vm3, %v1358_v56  ;;  %v3838_v1 = vld [vmem:[#allocation2 + $0x378] sm:$0xff]  ;;  %v1832_v37 = vmax.f32 %v1816_v60, %v3763_v47  ;;  %v2038_v27 = vmax.f32 %v3828_v58, %v3826_v57 }
 0x1ad   : > { %v2304_v0 = vld [vmem:[#allocation3 + $0x10] ss:$2 sm:$0xff]  ;;  %v2312_v6 = vld [vmem:[#allocation3 + $0x11] ss:$2 sm:$0xff]  ;;  %v2915_v36 = vpop.f32.mrb[58].mxu1  ;;  %v3846_v13 = vld [vmem:[#allocation2 + $0x360] sm:$0xff] }
 0x1ae   : > { %v1856_v8 = vld [vmem:[#allocation3 + $0x30] ss:$2 sm:$0xff]  ;;  %v3848_v15 = vld [vmem:[#allocation2 + $0x368] sm:$0xff]  ;;  %1847 = vst.msk [vmem:[#allocation3 + $0x50] sm:$0xff] %vm1389_vm3, %v1831_v59  ;;  %2120 = vst.msk [vmem:[#allocation4 + $0x10] sm:$0xff] %vm1389_vm3, %v2112_v62  ;;  %v2320_v46 = vrot.slane %v2312_v6, 7  ;;  %v2328_v18 = vmax.f32 %v2304_v0, %v2312_v6 }
 0x1af   : > { %v3841_v9 = vld [vmem:[#allocation3 + $0x30] sm:$0x1]  ;;  %1513 = vst.msk [vmem:[#allocation2 + $0x3d8] sm:$0xff] %vm1389_vm3, %v2915_v36  ;;  %v1361_v20 = vpop.f32.mrb[59].mxu1  ;;  %v1864_v7 = vld [vmem:[#allocation3 + $0x31] ss:$2 sm:$0xff]  ;;  %v2262_v43 = vmax.f32 %v3848_v15, %v3838_v1 }
 0x1b0   : > { %v3844_v5 = vld [vmem:[#allocation2 + $0x370] sm:$0xff]  ;;  %v2391_v23 = vld [vmem:[#allocation4 + $0x1] ss:$2 sm:$0xf]  ;;  %2152 = vst.msk [vmem:[#allocation4 + $0x10] sm:$0x1] %vm1685_vm4, %v2144_v4  ;;  %v1880_v32 = vmax.f32 %v1856_v8, %v1864_v7  ;;  %v2336_v35 = vmax.f32 %v2328_v18, %v2320_v46 }
 0x1b1   : > { %1511 = vst.msk [vmem:[#allocation2 + $0x3c8] sm:$0xff] %vm1389_vm3, %v1361_v20  ;;  %v1912_v24 = vld [vmem:[#allocation3 + $0x31] sm:$0x1]  ;;  %v3857_v26 = vld [vmem:[#allocation3 + $0x40] ss:$2 sm:$0xff]  ;;  %v3859_v28 = vld [vmem:[#allocation2 + $0x2b8] sm:$0xff]  ;;  %2407 = vrot.lane.b32.xlu0 %v2391_v23, %s3187_s15  ;;  %v2261_v56 = vmax.f32 %v3846_v13, %v3844_v5  ;;  %v2054_v13 = vmax.f32 %v2038_v27, %v3771_v2  ;;  %v2278_v2 = vmax.f32 %v2262_v43, %v3732_v25 }
 0x1b2   : > { %1848 = vst.msk [vmem:[#allocation3 + $0x58] sm:$0xff] %vm1389_vm3, %v1832_v37  ;;  %v3862_v47 = vld [vmem:[#allocation2 + $0x1d0] sm:$0xff]  ;;  %v1872_v3 = vrot.slane %v1864_v7, 7  ;;  %2068 = vst.msk [vmem:[#allocation3 + $0x30] sm:$0xff] %vm1389_vm3, %v2052_v29  ;;  %v2918_v14 = vpop.f32.mrb[60].mxu1  ;;  %v1797_v33 = vld [vmem:[#allocation2 + $0x1c0] sm:$0xff]  ;;  %v1920_v60 = vmax.f32 %v3841_v9, %v1912_v24 }
 0x1b3   : > { %2069 = vst.msk [vmem:[#allocation3 + $0x38] sm:$0xff] %vm1389_vm3, %v2053_v10  ;;  %v1865_v12 = vld [vmem:[#allocation3 + $0x41] ss:$2 sm:$0xff]  ;;  %1452 = vst.msk [vmem:[#allocation2 + $0x1f0] sm:$0xff] %vm1389_vm3, %v2854_v31  ;;  %v1118_v19 = vpop.f32.mrb[61].mxu0  ;;  %v1374_v41 = vpop.f32.mrb[61].mxu1  ;;  %v1817_v48 = vmax.f32 %v1797_v33, %v3862_v47 }
 0x1b4   : > { %v2167_v34 = vld [vmem:[#allocation4 + $0x9] ss:$2 sm:$0xf]  ;;  %v3870_v39 = vld [vmem:[#allocation4 + $0x18] ss:$2 sm:$0xf]  ;;  %v1888_v51 = vmax.f32 %v1880_v32, %v1872_v3  ;;  %v1881_v53 = vmax.f32 %v3857_v26, %v1865_v12  ;;  %v2277_v3 = vmax.f32 %v2261_v56, %v3753_v44 }
 0x1b5   : > { %1516 = vst.msk [vmem:[#allocation2 + $0x3f0] sm:$0xff] %vm1389_vm3, %v2918_v14  ;;  %2071 = vst.msk [vmem:[#allocation3 + $0x48] sm:$0xff] %vm1389_vm3, %v2055_v38  ;;  %v3874_v42 = vld [vmem:[#allocation2 + $0x2a8] sm:$0xff]  ;;  %v3881_v49 = vld [vmem:[#allocation2 + $0x1d8] sm:$0xff]  ;;  %2184 = vrot.lane.b32.xlu1 %v2167_v34, %s3187_s15  ;;  %v2855_v50 = vpop.f32.mrb[62].mxu0  ;;  %v2919_v0 = vpop.f32.mrb[62].mxu1  ;;  %v1833_v29 = vmax.f32 %v1817_v48, %v3803_v55 }
 0x1b6   : > { %v3878_v11 = vld [vmem:[#allocation4 + $0x8] ss:$2 sm:$0xf]  ;;  %1450 = vst.msk [vmem:[#allocation2 + $0x1e0] sm:$0xff] %vm1389_vm3, %v1118_v19  ;;  %1514 = vst.msk [vmem:[#allocation2 + $0x3e0] sm:$0xff] %vm1389_vm3, %v1374_v41  ;;  %v3887_v61 = vld [vmem:[#allocation2 + $0x2b0] sm:$0xff]  ;;  %v2041_v9 = vmax.f32 %v3874_v42, %v3859_v28 }
 0x1b7   : > { %v3889_v54 = vld [vmem:[#allocation2 + $0x2a0] sm:$0xff]  ;;  %v1798_v58 = vld [vmem:[#allocation2 + $0x1c8] sm:$0xff]  ;;  %2344 = vst.msk [vmem:[#allocation4 + $0x8] sm:$0xff] %vm1389_vm3, %v2336_v35  ;;  %1453 = vst.msk [vmem:[#allocation2 + $0x1f8] sm:$0xff] %vm1389_vm3, %v2855_v50  ;;  %v1121_v59 = vpop.f32.mrb[63].mxu0  ;;  %v1377_v36 = vpop.f32.mrb[63].mxu1 }
 0x1b8   : > { %v2305_v62 = vld [vmem:[#allocation3 + $0x20] ss:$2 sm:$0xff]  ;;  %v1818_v4 = vmax.f32 %v1798_v58, %v3881_v49  ;;  %1451 = vst.msk [vmem:[#allocation2 + $0x1e8] sm:$0xff] %vm1389_vm3, %v1121_v59  ;;  %1896 = vst.msk [vmem:[#allocation4 + $0x18] sm:$0xff] %vm1389_vm3, %v1888_v51  ;;  %v2313_v6 = vld [vmem:[#allocation3 + $0x21] ss:$2 sm:$0xff]  ;;  %v2040_v25 = vmax.f32 %v3889_v54, %v3887_v61  ;;  %v2057_v42 = vmax.f32 %v2041_v9, %v3790_v21 }
 0x1b9   : > { %1517 = vst.msk [vmem:[#allocation2 + $0x3f8] sm:$0xff] %vm1389_vm3, %v2919_v0  ;;  %v1873_v8 = vrot.slane %v1865_v12, 7  ;;  %v1905_v10 = vld [vmem:[#allocation3 + $0x40] sm:$0x1]  ;;  %v3904_v15 = vld [vmem:[#allocation2 + $0x390] sm:$0xff]  ;;  %v3908_v37 = vld [vmem:[#allocation2 + $0x398] sm:$0xff]  ;;  %v2329_v20 = vmax.f32 %v2305_v62, %v2313_v6 }
 0x1ba   : > { %v3906_v55 = vld [vmem:[#allocation2 + $0x380] sm:$0xff]  ;;  %1928 = vst.msk [vmem:[#allocation4 + $0x18] sm:$0x1] %vm1685_vm4, %v1920_v60  ;;  %v2168_v46 = vld [vmem:[#allocation4 + $0x11] ss:$2 sm:$0xf]  ;;  %v1834_v7 = vmax.f32 %v1818_v4, %v3816_v45  ;;  %v2056_v4 = vmax.f32 %v2040_v25, %v3826_v57 }
 0x1bb   : > { %v2321_v18 = vrot.slane %v2313_v6, 7  ;;  %1515 = vst.msk [vmem:[#allocation2 + $0x3e8] sm:$0xff] %vm1389_vm3, %v1377_v36  ;;  %v3912_v23 = vld [vmem:[#allocation4 + $0x20] ss:$2 sm:$0xf]  ;;  %v2240_v38 = vld [vmem:[#allocation2 + $0x388] sm:$0xff]  ;;  %2186 = vrot.lane.b32.xlu0 %v2168_v46, %s3187_s15  ;;  %v1889_v26 = vmax.f32 %v1881_v53, %v1873_v8  ;;  %v2263_v54 = vmax.f32 %v3906_v55, %v3904_v15 }
 0x1bc   : > { %1849 = vst.msk [vmem:[#allocation3 + $0x60] sm:$0xff] %vm1389_vm3, %v1833_v29  ;;  %v3917_v24 = vld [vmem:[#allocation4 + $0x10] ss:$2 sm:$0xf]  ;;  %v1913_v31 = vld [vmem:[#allocation3 + $0x41] sm:$0x1]  ;;  %v2264_v48 = vmax.f32 %v2240_v38, %v3908_v37 }
 0x1bd   : > { %v2081_v32 = vld [vmem:[#allocation3 + $0x30] ss:$2 sm:$0xff]  ;;  %v2089_v14 = vld [vmem:[#allocation3 + $0x31] ss:$2 sm:$0xff]  ;;  %v2337_v27 = vmax.f32 %v2329_v20, %v2321_v18  ;;  %v1921_v33 = vmax.f32 %v1905_v10, %v1913_v31  ;;  %2070 = vst.msk [vmem:[#allocation3 + $0x40] sm:$0xff] %vm1389_vm3, %v2054_v13  ;;  %v3926_v45 = vld [vmem:[#allocation2 + $0x2c0] sm:$0xff]  ;;  %v2279_v31 = vmax.f32 %v2263_v54, %v3844_v5 }
 0x1be   : > { %v2129_v12 = vld [vmem:[#allocation3 + $0x30] sm:$0x1]  ;;  %1850 = vst.msk [vmem:[#allocation3 + $0x68] sm:$0xff] %vm1389_vm3, %v1834_v7  ;;  %v2097_v19 = vrot.slane %v2089_v14, 7  ;;  %v2105_v41 = vmax.f32 %v2081_v32, %v2089_v14  ;;  %v2137_v44 = vld [vmem:[#allocation3 + $0x31] sm:$0x1]  ;;  %v2280_v57 = vmax.f32 %v2264_v48, %v3838_v1 }
 0x1bf   : > { %v3924_v34 = vld [vmem:[#allocation2 + $0x2d0] sm:$0xff]  ;;  %2294 = vst.msk [vmem:[#allocation3 + $0x38] sm:$0xff] %vm1389_vm3, %v2278_v2  ;;  %1897 = vst.msk [vmem:[#allocation4 + $0x20] sm:$0xff] %vm1389_vm3, %v1889_v26  ;;  %v3932_v43 = vld [vmem:[#allocation2 + $0x2d8] sm:$0xff]  ;;  %v2145_v10 = vmax.f32 %v2129_v12, %v2137_v44 }
 0x1c0   : > { %v1803_v35 = vld [vmem:[#allocation2 + $0x1f0] sm:$0xff]  ;;  %v1801_v50 = vld [vmem:[#allocation2 + $0x1e0] sm:$0xff]  ;;  %2293 = vst.msk [vmem:[#allocation3 + $0x30] sm:$0xff] %vm1389_vm3, %v2277_v3  ;;  %2345 = vst.msk [vmem:[#allocation4 + $0x10] sm:$0xff] %vm1389_vm3, %v2337_v27  ;;  %v2113_v59 = vmax.f32 %v2105_v41, %v2097_v19  ;;  %v2042_v46 = vmax.f32 %v3926_v45, %v3924_v34 }
 0x1c1   : > { %1929 = vst.msk [vmem:[#allocation4 + $0x20] sm:$0x1] %vm1685_vm4, %v1921_v33  ;;  %v1858_v51 = vld [vmem:[#allocation3 + $0x50] ss:$2 sm:$0xff]  ;;  %v2023_v53 = vld [vmem:[#allocation2 + $0x2c8] sm:$0xff]  ;;  %v1819_v56 = vmax.f32 %v1801_v50, %v1803_v35  ;;  %v3956_v2 = vld [vmem:[#allocation2 + $0x3a0] sm:$0xff] }
 0x1c2   : > { %v1804_v58 = vld [vmem:[#allocation2 + $0x1f8] sm:$0xff]  ;;  %v1802_v60 = vld [vmem:[#allocation2 + $0x1e8] sm:$0xff]  ;;  %v1906_v55 = vld [vmem:[#allocation3 + $0x50] sm:$0x1]  ;;  %v2043_v18 = vmax.f32 %v2023_v53, %v3932_v43 }
 0x1c3   : > { %v1866_v21 = vld [vmem:[#allocation3 + $0x51] ss:$2 sm:$0xff]  ;;  %v1835_v36 = vmax.f32 %v1819_v56, %v3862_v47  ;;  %v1820_v8 = vmax.f32 %v1802_v60, %v1804_v58  ;;  %v3946_v13 = vld [vmem:[#allocation4 + $0x18] ss:$2 sm:$0xf]  ;;  %v3958_v47 = vld [vmem:[#allocation2 + $0x3a8] sm:$0xff] }
 0x1c4   : > { %v1944_v62 = vld [vmem:[#allocation4 + $0x19] ss:$2 sm:$0xf]  ;;  %v1874_v0 = vrot.slane %v1866_v21, 7  ;;  %v1882_v29 = vmax.f32 %v1858_v51, %v1866_v21  ;;  %2073 = vst.msk [vmem:[#allocation3 + $0x58] sm:$0xff] %vm1389_vm3, %v2057_v42  ;;  %v3954_v20 = vld [vmem:[#allocation2 + $0x3b0] sm:$0xff]  ;;  %v2058_v42 = vmax.f32 %v2042_v46, %v3887_v61  ;;  %v2059_v48 = vmax.f32 %v2043_v18, %v3859_v28 }
 0x1c5   : > { %v3942_v6 = vld [vmem:[#allocation2 + $0x3b8] sm:$0xff]  ;;  %1963 = vrot.lane.b32.xlu1 %v1944_v62, %s3187_s15  ;;  %v3948_v9 = vld [vmem:[#allocation4 + $0x28] ss:$2 sm:$0xf]  ;;  %2121 = vst.msk [vmem:[#allocation4 + $0x18] sm:$0xff] %vm1389_vm3, %v2113_v59  ;;  %1851 = vst.msk [vmem:[#allocation3 + $0x70] sm:$0xff] %vm1389_vm3, %v1835_v36  ;;  %v1836_v3 = vmax.f32 %v1820_v8, %v3881_v49  ;;  %v2265_v58 = vmax.f32 %v3956_v2, %v3954_v20 }
 0x1c6   : > { %v2392_v38 = vld [vmem:[#allocation4 + $0x9] ss:$2 sm:$0xf]  ;;  %v1890_v7 = vmax.f32 %v1882_v29, %v1874_v0  ;;  %v1914_v26 = vld [vmem:[#allocation3 + $0x51] sm:$0x1]  ;;  %v3966_v27 = vld [vmem:[#allocation2 + $0x2f8] sm:$0xff]  ;;  %v2266_v50 = vmax.f32 %v3958_v47, %v3942_v6 }
 0x1c7   : > { %2153 = vst.msk [vmem:[#allocation4 + $0x18] sm:$0x1] %vm1685_vm4, %v2145_v10  ;;  %v2082_v1 = vld [vmem:[#allocation3 + $0x40] ss:$2 sm:$0xff]  ;;  %v2090_v32 = vld [vmem:[#allocation3 + $0x41] ss:$2 sm:$0xff]  ;;  %v1922_v12 = vmax.f32 %v1906_v55, %v1914_v26 }
 0x1c8   : > { %v2130_v14 = vld [vmem:[#allocation3 + $0x40] sm:$0x1]  ;;  %2072 = vst.msk [vmem:[#allocation3 + $0x50] sm:$0xff] %vm1389_vm3, %v2056_v4  ;;  %v1945_v33 = vld [vmem:[#allocation4 + $0x21] ss:$2 sm:$0xf]  ;;  %v2106_v45 = vmax.f32 %v2082_v1, %v2090_v32 }
 0x1c9   : > { %v2098_v25 = vrot.slane %v2090_v32, 7  ;;  %v2138_v35 = vld [vmem:[#allocation3 + $0x41] sm:$0x1]  ;;  %2296 = vst.msk [vmem:[#allocation3 + $0x48] sm:$0xff] %vm1389_vm3, %v2280_v57  ;;  %1898 = vst.msk [vmem:[#allocation4 + $0x28] sm:$0xff] %vm1389_vm3, %v1890_v7  ;;  %v2027_v5 = vld [vmem:[#allocation2 + $0x2e8] sm:$0xff]  ;;  %2409 = vrot.lane.b32.xlu1 %v2392_v38, %s3187_s15  ;;  %1965 = vrot.lane.b32.xlu0 %v1945_v33, %s3187_s15  ;;  %v2282_v38 = vmax.f32 %v2266_v50, %v3908_v37  ;;  %v2281_v32 = vmax.f32 %v2265_v58, %v3904_v15 }
 0x1ca   : > { %1852 = vst.msk [vmem:[#allocation3 + $0x78] sm:$0xff] %vm1389_vm3, %v1836_v3  ;;  %2295 = vst.msk [vmem:[#allocation3 + $0x40] sm:$0xff] %vm1389_vm3, %v2279_v31  ;;  %v3974_v49 = vld [vmem:[#allocation4 + $0x20] ss:$2 sm:$0xf]  ;;  %v3981_v51 = vld [vmem:[#allocation2 + $0x3d8] sm:$0xff]  ;;  %v2146_v21 = vmax.f32 %v2130_v14, %v2138_v35  ;;  %v2045_v8 = vmax.f32 %v2027_v5, %v3966_v27 }
 0x1cb   : > { %v2306_v19 = vld [vmem:[#allocation3 + $0x30] ss:$2 sm:$0xff]  ;;  %1930 = vst.msk [vmem:[#allocation4 + $0x28] sm:$0x1] %vm1685_vm4, %v1922_v12  ;;  %v1907_v41 = vld [vmem:[#allocation3 + $0x60] sm:$0x1]  ;;  %v2114_v53 = vmax.f32 %v2106_v45, %v2098_v25 }
 0x1cc   : > { %v1915_v44 = vld [vmem:[#allocation3 + $0x61] sm:$0x1]  ;;  %v2314_v54 = vld [vmem:[#allocation3 + $0x31] ss:$2 sm:$0xff]  ;;  %v2248_v59 = vld [vmem:[#allocation2 + $0x3c8] sm:$0xff]  ;;  %v2061_v15 = vmax.f32 %v2045_v8, %v3932_v43 }
 0x1cd   : > { %v2393_v56 = vld [vmem:[#allocation4 + $0x11] ss:$2 sm:$0xf]  ;;  %v2322_v60 = vrot.slane %v2314_v54, 7  ;;  %v2330_v62 = vmax.f32 %v2306_v19, %v2314_v54  ;;  %v1859_v0 = vld [vmem:[#allocation3 + $0x60] ss:$2 sm:$0xff]  ;;  %v2268_v7 = vmax.f32 %v2248_v59, %v3981_v51  ;;  %v1923_v27 = vmax.f32 %v1907_v41, %v1915_v44 }
 0x1ce   : > { %v1867_v29 = vld [vmem:[#allocation3 + $0x61] ss:$2 sm:$0xff]  ;;  %2122 = vst.msk [vmem:[#allocation4 + $0x20] sm:$0xff] %vm1389_vm3, %v2114_v53  ;;  %v2351_v4 = vld [vmem:[#allocation3] sm:$0x1]  ;;  %v3989_v10 = vld [vmem:[#allocation2 + $0x3d0] sm:$0xff]  ;;  %2411 = vrot.lane.b32.xlu0 %v2393_v56, %s3187_s15 }
 0x1cf   : > { %v1875_v28 = vrot.slane %v1867_v29, 7  ;;  %v1883_v61 = vmax.f32 %v1859_v0, %v1867_v29  ;;  %2074 = vst.msk [vmem:[#allocation3 + $0x60] sm:$0xff] %vm1389_vm3, %v2058_v42  ;;  %2075 = vst.msk [vmem:[#allocation3 + $0x68] sm:$0xff] %vm1389_vm3, %v2059_v48  ;;  %v2359_v36 = vld [vmem:[#allocation3 + $0x1] sm:$0x1]  ;;  %v2338_v18 = vmax.f32 %v2330_v62, %v2322_v60  ;;  %v2028_v47 = vld [vmem:[#allocation2 + $0x2f0] sm:$0xff]  ;;  %v2284_v44 = vmax.f32 %v2268_v7, %v3942_v6 }
 0x1d0   : > { %v2247_v55 = vld [vmem:[#allocation2 + $0x3c0] sm:$0xff]  ;;  %2154 = vst.msk [vmem:[#allocation4 + $0x20] sm:$0x1] %vm1685_vm4, %v2146_v21  ;;  %v2169_v46 = vld [vmem:[#allocation4 + $0x19] ss:$2 sm:$0xf]  ;;  %v2367_v2 = vmax.f32 %v2351_v4, %v2359_v36 }
 0x1d1   : > { %v3993_v57 = vld [vmem:[#allocation4 + $0x30] ss:$2 sm:$0xf]  ;;  %v3997_v26 = vld [vmem:[#allocation4 + $0x18] ss:$2 sm:$0xf]  ;;  %2188 = vrot.lane.b32.xlu1 %v2169_v46, %s3187_s15  ;;  %v1891_v3 = vmax.f32 %v1883_v61, %v1875_v28  ;;  %v2267_v37 = vmax.f32 %v2247_v55, %v3989_v10 }
 0x1d2   : > { %v2083_v31 = vld [vmem:[#allocation3 + $0x50] ss:$2 sm:$0xff]  ;;  %v2026_v1 = vld [vmem:[#allocation2 + $0x2e0] sm:$0xff]  ;;  %2346 = vst.msk [vmem:[#allocation4 + $0x18] sm:$0xff] %vm1389_vm3, %v2338_v18  ;;  %v2091_v12 = vld [vmem:[#allocation3 + $0x51] ss:$2 sm:$0xff] }
 0x1d3   : > { %v1946_v14 = vld [vmem:[#allocation4 + $0x29] ss:$2 sm:$0xf]  ;;  %2375 = vst.msk [vmem:[#allocation4] sm:$0x1] %vm1685_vm4, %v2367_v2  ;;  %v2099_v33 = vrot.slane %v2091_v12, 7  ;;  %v2107_v25 = vmax.f32 %v2083_v31, %v2091_v12  ;;  %v2044_v41 = vmax.f32 %v2026_v1, %v2028_v47  ;;  %v2283_v60 = vmax.f32 %v2267_v37, %v3954_v20  ;;  %v1734_v1 = vpop.permute.xlu0 %1733 }
 0x1d4   : > { %v2131_v45 = vld [vmem:[#allocation3 + $0x50] sm:$0x1]  ;;  %v2139_v35 = vld [vmem:[#allocation3 + $0x51] sm:$0x1]  ;;  %2298 = vst.msk [vmem:[#allocation3 + $0x58] sm:$0xff] %vm1389_vm3, %v2282_v38  ;;  %1899 = vst.msk [vmem:[#allocation4 + $0x30] sm:$0xff] %vm1389_vm3, %v1891_v3  ;;  %v1757_v37 = vsel %vm1389_vm3, %v3673_v22, %v1734_v1 }
 0x1d5   : > { %2297 = vst.msk [vmem:[#allocation3 + $0x50] sm:$0xff] %vm1389_vm3, %v2281_v32  ;;  %v4008_v5 = vld [vmem:[#allocation4 + $0x28] ss:$2 sm:$0xf]  ;;  %v2115_v42 = vmax.f32 %v2107_v25, %v2099_v33  ;;  %1967 = vrot.lane.b32.xlu1 %v1946_v14, %s3187_s15  ;;  %v2315_v48 = vld [vmem:[#allocation3 + $0x41] ss:$2 sm:$0xff]  ;;  %v2147_v54 = vmax.f32 %v2131_v45, %v2139_v35  ;;  %v2060_v20 = vmax.f32 %v2044_v41, %v3924_v34 }
 0x1d6   : > { %v2307_v19 = vld [vmem:[#allocation3 + $0x40] ss:$2 sm:$0xff]  ;;  %1931 = vst.msk [vmem:[#allocation4 + $0x30] sm:$0x1] %vm1685_vm4, %v1923_v27  ;;  %v1860_v50 = vld [vmem:[#allocation3 + $0x70] ss:$2 sm:$0xff] }
 0x1d7   : > { %v1868_v53 = vld [vmem:[#allocation3 + $0x71] ss:$2 sm:$0xff]  ;;  %v2170_v56 = vld [vmem:[#allocation4 + $0x21] ss:$2 sm:$0xf]  ;;  %v2323_v43 = vrot.slane %v2315_v48, 7  ;;  %v2331_v58 = vmax.f32 %v2307_v19, %v2315_v48 }
 0x1d8   : > { %v2084_v59 = vld [vmem:[#allocation3 + $0x60] ss:$2 sm:$0xff]  ;;  %v1884_v21 = vmax.f32 %v1860_v50, %v1868_v53  ;;  %2077 = vst.msk [vmem:[#allocation3 + $0x78] sm:$0xff] %vm1389_vm3, %v2061_v15  ;;  %2123 = vst.msk [vmem:[#allocation4 + $0x28] sm:$0xff] %vm1389_vm3, %v2115_v42  ;;  %2190 = vrot.lane.b32.xlu0 %v2170_v56, %s3187_s15  ;;  %v2092_v6 = vld [vmem:[#allocation3 + $0x61] ss:$2 sm:$0xff] }
 0x1d9   : > { %v4016_v62 = vld [vmem:[#allocation4 + $0x20] ss:$2 sm:$0xf]  ;;  %v1876_v0 = vrot.slane %v1868_v53, 7  ;;  %2155 = vst.msk [vmem:[#allocation4 + $0x28] sm:$0x1] %vm1685_vm4, %v2147_v54  ;;  %v2339_v29 = vmax.f32 %v2331_v58, %v2323_v43  ;;  %v2108_v61 = vmax.f32 %v2084_v59, %v2092_v6 }
 0x1da   : > { %v2100_v28 = vrot.slane %v2092_v6, 7  ;;  %v2132_v4 = vld [vmem:[#allocation3 + $0x60] sm:$0x1]  ;;  %v2140_v36 = vld [vmem:[#allocation3 + $0x61] sm:$0x1]  ;;  %2300 = vst.msk [vmem:[#allocation3 + $0x68] sm:$0xff] %vm1389_vm3, %v2284_v44 }
 0x1db   : > { %v4022_v8 = vld [vmem:[#allocation4 + $0x38] ss:$2 sm:$0xf]  ;;  %v2253_v55 = vld [vmem:[#allocation2 + $0x3f0] sm:$0xff]  ;;  %v2251_v46 = vld [vmem:[#allocation2 + $0x3e0] sm:$0xff]  ;;  %2299 = vst.msk [vmem:[#allocation3 + $0x60] sm:$0xff] %vm1389_vm3, %v2283_v60  ;;  %v1892_v2 = vmax.f32 %v1884_v21, %v1876_v0  ;;  %v2148_v34 = vmax.f32 %v2132_v4, %v2140_v36 }
 0x1dc   : > { %v2394_v18 = vld [vmem:[#allocation4 + $0x19] ss:$2 sm:$0xf]  ;;  %v1908_v47 = vld [vmem:[#allocation3 + $0x70] sm:$0x1]  ;;  %2347 = vst.msk [vmem:[#allocation4 + $0x20] sm:$0xff] %vm1389_vm3, %v2339_v29  ;;  %v2116_v3 = vmax.f32 %v2108_v61, %v2100_v28  ;;  %v2269_v19 = vmax.f32 %v2251_v46, %v2253_v55 }
 0x1dd   : > { %v2352_v38 = vld [vmem:[#allocation3 + $0x10] sm:$0x1]  ;;  %v2254_v7 = vld [vmem:[#allocation2 + $0x3f8] sm:$0xff]  ;;  %2413 = vrot.lane.b32.xlu1 %v2394_v18, %s3187_s15  ;;  %v1947_v31 = vld [vmem:[#allocation4 + $0x31] ss:$2 sm:$0xf] }
 0x1de   : > { %v1916_v32 = vld [vmem:[#allocation3 + $0x71] sm:$0x1]  ;;  %v2252_v14 = vld [vmem:[#allocation2 + $0x3e8] sm:$0xff]  ;;  %1969 = vrot.lane.b32.xlu0 %v1947_v31, %s3187_s15  ;;  %v4029_v12 = vld [vmem:[#allocation4 + $0x30] ss:$2 sm:$0xf]  ;;  %v2285_v28 = vmax.f32 %v2269_v19, %v3989_v10 }
 0x1df   : > { %v2308_v27 = vld [vmem:[#allocation3 + $0x50] ss:$2 sm:$0xff]  ;;  %1900 = vst.msk [vmem:[#allocation4 + $0x38] sm:$0xff] %vm1389_vm3, %v1892_v2  ;;  %v1924_v33 = vmax.f32 %v1908_v47, %v1916_v32  ;;  %2076 = vst.msk [vmem:[#allocation3 + $0x70] sm:$0xff] %vm1389_vm3, %v2060_v20  ;;  %v2316_v25 = vld [vmem:[#allocation3 + $0x51] ss:$2 sm:$0xff]  ;;  %v2270_v41 = vmax.f32 %v2252_v14, %v2254_v7  ;;  %v1736_v20 = vpop.permute.xlu0 %1735 }
 0x1e0   : > { %2124 = vst.msk [vmem:[#allocation4 + $0x30] sm:$0xff] %vm1389_vm3, %v2116_v3  ;;  %1765 = vst [vmem:[%s4038_s4] sm:$0xf] %v1757_v37  ;;  %v2324_v45 = vrot.slane %v2316_v25, 7  ;;  %v2332_v35 = vmax.f32 %v2308_v27, %v2316_v25  ;;  %v2360_v22 = vld [vmem:[#allocation3 + $0x11] sm:$0x1]  ;;  %v1758_v2 = vsel %vm1389_vm3, %v3740_v30, %v1736_v20 }
 0x1e1   : > { %2156 = vst.msk [vmem:[#allocation4 + $0x30] sm:$0x1] %vm1685_vm4, %v2148_v34  ;;  %1932 = vst.msk [vmem:[#allocation4 + $0x38] sm:$0x1] %vm1685_vm4, %v1924_v33  ;;  %v2353_v15 = vld [vmem:[#allocation3 + $0x20] sm:$0x1]  ;;  %v2368_v42 = vmax.f32 %v2352_v38, %v2360_v22  ;;  %v2286_v61 = vmax.f32 %v2270_v41, %v3981_v51 }
 0x1e2   : > { %v2171_v44 = vld [vmem:[#allocation4 + $0x29] ss:$2 sm:$0xf]  ;;  %v2361_v48 = vld [vmem:[#allocation3 + $0x21] sm:$0x1]  ;;  %v2340_v53 = vmax.f32 %v2332_v35, %v2324_v45  ;;  %v1738_v35 = vpop.permute.xlu1 %1737 }
 0x1e3   : > { %v4043_v50 = vld [vmem:[#allocation4 + $0x28] ss:$2 sm:$0xf]  ;;  %2192 = vrot.lane.b32.xlu1 %v2171_v44, %s3187_s15  ;;  %v2369_v54 = vmax.f32 %v2353_v15, %v2361_v48  ;;  %v2354_v56 = vld [vmem:[#allocation3 + $0x30] sm:$0x1]  ;;  %v1759_v19 = vsel %vm1389_vm3, %v3760_v52, %v1738_v35 }
 0x1e4   : > { %v2309_v43 = vld [vmem:[#allocation3 + $0x60] ss:$2 sm:$0xff]  ;;  %v2317_v58 = vld [vmem:[#allocation3 + $0x61] ss:$2 sm:$0xff]  ;;  %2376 = vst.msk [vmem:[#allocation4 + $0x8] sm:$0x1] %vm1685_vm4, %v2368_v42 }
 0x1e5   : > { %v2362_v59 = vld [vmem:[#allocation3 + $0x31] sm:$0x1]  ;;  %2348 = vst.msk [vmem:[#allocation4 + $0x28] sm:$0xff] %vm1389_vm3, %v2340_v53  ;;  %v2395_v21 = vld [vmem:[#allocation4 + $0x21] ss:$2 sm:$0xf]  ;;  %v2333_v6 = vmax.f32 %v2309_v43, %v2317_v58 }
 0x1e6   : > { %v2325_v60 = vrot.slane %v2317_v58, 7  ;;  %2377 = vst.msk [vmem:[#allocation4 + $0x10] sm:$0x1] %vm1685_vm4, %v2369_v54  ;;  %v2370_v0 = vmax.f32 %v2354_v56, %v2362_v59  ;;  %v2355_v29 = vld [vmem:[#allocation3 + $0x40] sm:$0x1]  ;;  %2415 = vrot.lane.b32.xlu0 %v2395_v21, %s3187_s15  ;;  %v1740_v52 = vpop.permute.xlu1 %1739 }
 0x1e7   : > { %v1948_v4 = vld [vmem:[#allocation4 + $0x39] ss:$2 sm:$0xf]  ;;  %v2085_v36 = vld [vmem:[#allocation3 + $0x70] ss:$2 sm:$0xff]  ;;  %v1760_v59 = vsel %vm1389_vm3, %v3870_v39, %v1740_v52 }
 0x1e8   : > { %v2093_v55 = vld [vmem:[#allocation3 + $0x71] ss:$2 sm:$0xff]  ;;  %v2133_v46 = vld [vmem:[#allocation3 + $0x70] sm:$0x1]  ;;  %1971 = vrot.lane.b32.xlu1 %v1948_v4, %s3187_s15  ;;  %2378 = vst.msk [vmem:[#allocation4 + $0x18] sm:$0x1] %vm1685_vm4, %v2370_v0  ;;  %v2341_v38 = vmax.f32 %v2333_v6, %v2325_v60  ;;  %v1742_v60 = vpop.permute.xlu0 %1741 }
 0x1e9   : > { %v2141_v18 = vld [vmem:[#allocation3 + $0x71] sm:$0x1]  ;;  %v4056_v47 = vld [vmem:[#allocation4 + $0x30] ss:$2 sm:$0xf]  ;;  %v2101_v10 = vrot.slane %v2093_v55, 7  ;;  %v2109_v51 = vmax.f32 %v2085_v36, %v2093_v55  ;;  %v1761_v6 = vsel %vm1389_vm3, %v3912_v23, %v1742_v60 }
 0x1ea   : > { %2301 = vst.msk [vmem:[#allocation3 + $0x70] sm:$0xff] %vm1389_vm3, %v2285_v28  ;;  %2302 = vst.msk [vmem:[#allocation3 + $0x78] sm:$0xff] %vm1389_vm3, %v2286_v61  ;;  %v2363_v7 = vld [vmem:[#allocation3 + $0x41] sm:$0x1]  ;;  %v2356_v30 = vld [vmem:[#allocation3 + $0x50] sm:$0x1]  ;;  %v2149_v27 = vmax.f32 %v2133_v46, %v2141_v18 }
 0x1eb   : > { %1766 = vst [vmem:[%s4038_s4 + $0x4] sm:$0xf] %v1758_v2  ;;  %v4061_v31 = vld [vmem:[#allocation4 + $0x38] ss:$2 sm:$0xf]  ;;  %v2371_v1 = vmax.f32 %v2355_v29, %v2363_v7  ;;  %v2117_v32 = vmax.f32 %v2109_v51, %v2101_v10 }
 0x1ec   : > { %v2172_v3 = vld [vmem:[#allocation4 + $0x31] ss:$2 sm:$0xf]  ;;  %v2357_v34 = vld [vmem:[#allocation3 + $0x60] sm:$0x1] }
 0x1ed   : > { %2194 = vrot.lane.b32.xlu0 %v2172_v3, %s3187_s15  ;;  %2349 = vst.msk [vmem:[#allocation4 + $0x30] sm:$0xff] %vm1389_vm3, %v2341_v38  ;;  %v2364_v14 = vld [vmem:[#allocation3 + $0x51] sm:$0x1]  ;;  %v2365_v33 = vld [vmem:[#allocation3 + $0x61] sm:$0x1]  ;;  %2125 = vst.msk [vmem:[#allocation4 + $0x38] sm:$0xff] %vm1389_vm3, %v2117_v32 }
 0x1ee   : > { %2379 = vst.msk [vmem:[#allocation4 + $0x20] sm:$0x1] %vm1685_vm4, %v2371_v1  ;;  %v2372_v37 = vmax.f32 %v2356_v30, %v2364_v14  ;;  %v2396_v25 = vld [vmem:[#allocation4 + $0x29] ss:$2 sm:$0xf]  ;;  %v2373_v45 = vmax.f32 %v2357_v34, %v2365_v33 }
 0x1ef   : > { %2157 = vst.msk [vmem:[#allocation4 + $0x38] sm:$0x1] %vm1685_vm4, %v2149_v27  ;;  %2417 = vrot.lane.b32.xlu1 %v2396_v25, %s3187_s15  ;;  %1767 = vst [vmem:[%s4038_s4 + $0x8] sm:$0xf] %v1759_v19 }
 0x1f0   : > { %2380 = vst.msk [vmem:[#allocation4 + $0x28] sm:$0x1] %vm1685_vm4, %v2372_v37  ;;  %2381 = vst.msk [vmem:[#allocation4 + $0x30] sm:$0x1] %vm1685_vm4, %v2373_v45  ;;  %v1744_v0 = vpop.permute.xlu1 %1743 }
 0x1f1   : > { %v2310_v22 = vld [vmem:[#allocation3 + $0x70] ss:$2 sm:$0xff]  ;;  %v2318_v15 = vld [vmem:[#allocation3 + $0x71] ss:$2 sm:$0xff]  ;;  %1768 = vst [vmem:[%s4038_s4 + $0xc] sm:$0xf] %v1760_v59  ;;  %v1762_v29 = vsel %vm1389_vm3, %v3948_v9, %v1744_v0 }
 0x1f2   : > { %v2326_v41 = vrot.slane %v2318_v15, 7  ;;  %v2334_v44 = vmax.f32 %v2310_v22, %v2318_v15  ;;  %v2358_v42 = vld [vmem:[#allocation3 + $0x70] sm:$0x1]  ;;  %v2366_v53 = vld [vmem:[#allocation3 + $0x71] sm:$0x1] }
 0x1f3   : > { %v2374_v58 = vmax.f32 %v2358_v42, %v2366_v53  ;;  %1769 = vst [vmem:[%s4038_s4 + $0x10] sm:$0xf] %v1761_v6  ;;  %1770 = vst [vmem:[%s4038_s4 + $0x14] sm:$0xf] %v1762_v29 }
 0x1f4   : > { %v2397_v48 = vld [vmem:[#allocation4 + $0x31] ss:$2 sm:$0xf]  ;;  %v2173_v54 = vld [vmem:[#allocation4 + $0x39] ss:$2 sm:$0xf]  ;;  %v2342_v56 = vmax.f32 %v2334_v44, %v2326_v41 }
 0x1f5   : > { %2419 = vrot.lane.b32.xlu0 %v2397_v48, %s3187_s15  ;;  %2196 = vrot.lane.b32.xlu1 %v2173_v54, %s3187_s15  ;;  %v2384_v7 = vld [vmem:[#allocation4 + $0x8] ss:$2 sm:$0xf]  ;;  %v2386_v25 = vld [vmem:[#allocation4 + $0x18] ss:$2 sm:$0xf] }
 0x1f6   : > { %v4075_v43 = vld [vmem:[#allocation4 + $0x38] ss:$2 sm:$0xf] }
 0x1f7   : > { %2350 = vst.msk [vmem:[#allocation4 + $0x38] sm:$0xff] %vm1389_vm3, %v2342_v56 }
 0x1f8   : > { %2382 = vst.msk [vmem:[#allocation4 + $0x38] sm:$0x1] %vm1685_vm4, %v2374_v58  ;;  %v1746_v28 = vpop.permute.xlu0 %1745  ;;  %v2389_v58 = vld [vmem:[#allocation4 + $0x30] ss:$2 sm:$0xf] }
 0x1f9   : > { %v1763_v39 = vsel %vm1389_vm3, %v3993_v57, %v1746_v28 }
 0x1fa   : > { %1771 = vst [vmem:[%s4038_s4 + $0x18] sm:$0xf] %v1763_v39 }
 0x1fe   : > { %v2398_v21 = vld [vmem:[#allocation4 + $0x39] ss:$2 sm:$0xf] }
 0x1ff   : > { %2421 = vrot.lane.b32.xlu1 %v2398_v21, %s3187_s15  ;;  %v2390_v21 = vld [vmem:[#allocation4 + $0x38] ss:$2 sm:$0xf] }
 0x200   : > { %v1748_v61 = vpop.permute.xlu1 %1747 }
 0x201   : > { %v1764_v4 = vsel %vm1389_vm3, %v4022_v8, %v1748_v61 }
 0x202   : > { %1772 = vst [vmem:[%s4038_s4 + $0x1c] sm:$0xf] %v1764_v4 }
 0x209   : > { %v1958_v23 = vpop.permute.xlu0 %1957 }
 0x20a   : > { %v1981_v36 = vsel %vm1389_vm3, %v3725_v17, %v1958_v23  ;;  %v2383_v17 = vld [vmem:[#allocation4] ss:$2 sm:$0xf] }
 0x20b   : > { %2688 = vst [vmem:[%s4038_s4 + $0x20] sm:$0xf] %v1981_v36 }
 0x217   : > { %v2183_v9 = vpop.permute.xlu0 %2182 }
 0x218   : > { %v2206_v20 = vsel %vm1389_vm3, %v3783_v16, %v2183_v9 }
 0x219   : > { %2696 = vst [vmem:[%s4038_s4 + $0x40] sm:$0xf] %v2206_v20 }
 0x21a   : > { %v1960_v55 = vpop.permute.xlu1 %1959 }
 0x21b   : > { %v1982_v57 = vsel %vm1389_vm3, %v3810_v40, %v1960_v55 }
 0x21c   : > { %2689 = vst [vmem:[%s4038_s4 + $0x24] sm:$0xf] %v1982_v57 }
 0x21d   : > { %v1962_v8 = vpop.permute.xlu0 %1961 }
 0x21e   : > { %v1983_v46 = vsel %vm1389_vm3, %v3834_v63, %v1962_v8 }
 0x21f   : > { %2690 = vst [vmem:[%s4038_s4 + $0x28] sm:$0xf] %v1983_v46 }
 0x223   : > { %v2408_v18 = vpop.permute.xlu0 %2407 }
 0x224   : > { %v2431_v2 = vsel %vm1389_vm3, %v2383_v17, %v2408_v18 }
 0x225   : > { %2704 = vst [vmem:[%s4038_s4 + $0x60] sm:$0xf] %v2431_v2 }
 0x227   : > { %v2185_v10 = vpop.permute.xlu1 %2184 }
 0x228   : > { %v2207_v16 = vsel %vm1389_vm3, %v3878_v11, %v2185_v10 }
 0x229   : > { %2697 = vst [vmem:[%s4038_s4 + $0x44] sm:$0xf] %v2207_v16 }
 0x22d   : > { %v2187_v40 = vpop.permute.xlu0 %2186 }
 0x22e   : > { %v2208_v51 = vsel %vm1389_vm3, %v3917_v24, %v2187_v40  ;;  %v2385_v24 = vld [vmem:[#allocation4 + $0x10] ss:$2 sm:$0xf] }
 0x22f   : > { %2698 = vst [vmem:[%s4038_s4 + $0x48] sm:$0xf] %v2208_v51 }
 0x237   : > { %v1964_v63 = vpop.permute.xlu1 %1963 }
 0x238   : > { %v1984_v38 = vsel %vm1389_vm3, %v3946_v13, %v1964_v63 }
 0x239   : > { %2691 = vst [vmem:[%s4038_s4 + $0x2c] sm:$0xf] %v1984_v38 }
 0x23b   : > { %v2410_v3 = vpop.permute.xlu1 %2409  ;;  %v1966_v1 = vpop.permute.xlu0 %1965 }
 0x23c   : > { %v2432_v32 = vsel %vm1389_vm3, %v2384_v7, %v2410_v3  ;;  %v1985_v11 = vsel %vm1389_vm3, %v3974_v49, %v1966_v1 }
 0x23d   : > { %2705 = vst [vmem:[%s4038_s4 + $0x64] sm:$0xf] %v2432_v32  ;;  %2692 = vst [vmem:[%s4038_s4 + $0x30] sm:$0xf] %v1985_v11 }
 0x240   : > { %v2412_v30 = vpop.permute.xlu0 %2411 }
 0x241   : > { %v2433_v34 = vsel %vm1389_vm3, %v2385_v24, %v2412_v30 }
 0x242   : > { %2706 = vst [vmem:[%s4038_s4 + $0x68] sm:$0xf] %v2433_v34 }
 0x243   : > { %v2189_v14 = vpop.permute.xlu1 %2188 }
 0x244   : > { %v2209_v13 = vsel %vm1389_vm3, %v3997_v26, %v2189_v14 }
 0x245   : > { %2699 = vst [vmem:[%s4038_s4 + $0x4c] sm:$0xf] %v2209_v13 }
 0x247   : > { %v1968_v27 = vpop.permute.xlu1 %1967 }
 0x248   : > { %v1986_v37 = vsel %vm1389_vm3, %v4008_v5, %v1968_v27 }
 0x249   : > { %2693 = vst [vmem:[%s4038_s4 + $0x34] sm:$0xf] %v1986_v37 }
 0x24a   : > { %v2191_v49 = vpop.permute.xlu0 %2190 }
 0x24b   : > { %v2210_v33 = vsel %vm1389_vm3, %v4016_v62, %v2191_v49  ;;  %v2387_v62 = vld [vmem:[#allocation4 + $0x20] ss:$2 sm:$0xf] }
 0x24c   : > { %2700 = vst [vmem:[%s4038_s4 + $0x50] sm:$0xf] %v2210_v33 }
 0x24f   : > { %v2414_v45 = vpop.permute.xlu1 %2413 }
 0x250   : > { %v2434_v35 = vsel %vm1389_vm3, %v2386_v25, %v2414_v45  ;;  %v1970_v26 = vpop.permute.xlu0 %1969 }
 0x251   : > { %2707 = vst [vmem:[%s4038_s4 + $0x6c] sm:$0xf] %v2434_v35  ;;  %v1987_v22 = vsel %vm1389_vm3, %v4029_v12, %v1970_v26 }
 0x252   : > { %2694 = vst [vmem:[%s4038_s4 + $0x38] sm:$0xf] %v1987_v22 }
 0x255   : > { %v2193_v5 = vpop.permute.xlu1 %2192 }
 0x256   : > { %v2211_v15 = vsel %vm1389_vm3, %v4043_v50, %v2193_v5  ;;  %v2388_v50 = vld [vmem:[#allocation4 + $0x28] ss:$2 sm:$0xf] }
 0x257   : > { %2701 = vst [vmem:[%s4038_s4 + $0x54] sm:$0xf] %v2211_v15 }
 0x258   : > { %v2416_v19 = vpop.permute.xlu0 %2415 }
 0x259   : > { %v2435_v41 = vsel %vm1389_vm3, %v2387_v62, %v2416_v19 }
 0x25a   : > { %v1972_v44 = vpop.permute.xlu1 %1971  ;;  %2708 = vst [vmem:[%s4038_s4 + $0x70] sm:$0xf] %v2435_v41 }
 0x25b   : > { %v1988_v42 = vsel %vm1389_vm3, %v4061_v31, %v1972_v44 }
 0x25c   : > { %2695 = vst [vmem:[%s4038_s4 + $0x3c] sm:$0xf] %v1988_v42 }
 0x25f   : > { %v2195_v12 = vpop.permute.xlu0 %2194 }
 0x260   : > { %v2212_v48 = vsel %vm1389_vm3, %v4056_v47, %v2195_v12 }
 0x261   : > { %2702 = vst [vmem:[%s4038_s4 + $0x58] sm:$0xf] %v2212_v48  ;;  %v2418_v53 = vpop.permute.xlu1 %2417 }
 0x262   : > { %v2436_v54 = vsel %vm1389_vm3, %v2388_v50, %v2418_v53 }
 0x263   : > { %2709 = vst [vmem:[%s4038_s4 + $0x74] sm:$0xf] %v2436_v54 }
 0x267   : > { %v2420_v56 = vpop.permute.xlu0 %2419  ;;  %v2197_v31 = vpop.permute.xlu1 %2196 }
 0x268   : > { %v2437_v52 = vsel %vm1389_vm3, %v2389_v58, %v2420_v56  ;;  %v2213_v59 = vsel %vm1389_vm3, %v4075_v43, %v2197_v31 }
 0x269   : > { %2710 = vst [vmem:[%s4038_s4 + $0x78] sm:$0xf] %v2437_v52  ;;  %2703 = vst [vmem:[%s4038_s4 + $0x5c] sm:$0xf] %v2213_v59 }
 0x271   : > { %v2422_v47 = vpop.permute.xlu1 %2421 }
 0x272   : > { %v2438_v60 = vsel %vm1389_vm3, %v2390_v21, %v2422_v47 }
 0x273   : > { %2711 = vst [vmem:[%s4038_s4 + $0x7c] sm:$0xf] %v2438_v60 }
 0x274   : > { %3123 = shalt.err (!%p3120_p7)
}
 0x275   : > { %s3124_s24 = scalar_lea.hbm %s4163_s28, 2048  ;;  %s3128_s29 = scalar_lea.hbm %s4215_s2, 4096 }
 0x276   : > { %p3125_p9 = scmp.ne.s32.totalorder %s4163_s28, %s3124_s24  ;;  %p3129_p5 = scmp.lt.u32.totalorder %s4163_s28, %s4215_s2 }
 0x277   : > { %p3130_p11 = scmp.lt.u32.totalorder %s3128_s29, %s3124_s24  ;;  %p3132_p4 = scmp.lt.u32.totalorder %s3124_s24, %s4163_s28 }
 0x278   : > { %p3126_p1 = pnand %p3125_p9, %p3299_p12 }
 0x279   : > { %p3131_p2 = por %p3130_p11, %p3129_p5 }
 0x27a   : > { %p3127_p0 = pneg %p3126_p1 }
 0x27b   : > { %p3133_p6 = por %p3132_p4, %p3131_p2 }
 0x27d   : > { %p3134_p8 = pnand %p3133_p6, %p3127_p0 }
 0x27f   : > { %3137 = shalt.err (!%p3134_p8)
}
 0x280   : > { %s3189_s17 = smov 4  }
 0x281   : > { %2930 = dma.vmem_to_hbm [thread:$0]  (%p3299_p12), %s4165_s27, 2048, %s4163_s28, %s2449_s6, %s3187_s15, %s3187_s15, %s3189_s17  }
 0x282 PF: > { %s2478_s4 = sand.u32 1, %s3168_s9   ;;  %p4230_p10 = scmp.ne.s32.totalorder %s4220_s16, 0 }
 0x283   : > { %p4231_p13 = scmp.ge.s32.totalorder %s3180_s12, 2  ;;  %s2479_s5 = scalar_lea.sflag [#allocation7], %s2478_s4 }
 0x285   : > { %p2941_p3 = pnand %p4231_p13, %p4230_p10 }
 0x287   : > { %3163 = dma.done.wait (!%p2941_p3), %s2479_s5, 2048  }
 0x288   : > { %3165 = vsyncadd (!%p2941_p3), %s2479_s5, 4294965248  ;;  %p16_p7 = scmp.ge.s32.totalorder %s3261_s21, 4   ;;  %s4232_s9 = smov %s3172_s10 }
 0x289   : > { %s4233_s10 = smov %s3176_s11  ;;  %s4234_s11 = smov %s3295_s8 }
 0x28a   : > { %s4235_s12 = smov %s3261_s21  ;;  %18 = sbr.rel (!%p16_p7) target bundleno = 6 (0x6), region = 110 }
 0x291   :  { %2484 = vsyncpa [#allocation6], 1 }
 0x292   :  { %2486 = vsyncpa [#allocation6 + $0x1], 1 }
 0x293   :  { %2487 = vsyncpa [#allocation9], 1 }
 0x294   :  { %2488 = vsyncpa [#allocation7], 1 }
 0x295   :  { %2490 = vsyncpa [#allocation7 + $0x1], 1 }

</bundles_post_ra>
